<compile_context>
chip_gen: v5e
topology: v5e:2x2
jax: 0.10.0
libtpu: 0.0.40
codegen_flags: <defaults>
</compile_context>

<pallas_src>
import functools
import math

import jax
import jax.numpy as jnp
from jax.experimental import pallas as pl
from jax.experimental.pallas import tpu as pltpu

MATMUL_DTYPE = jnp.bfloat16  # MXU operand dtype; accumulation / elementwise stay f32.


# ------------------------------ fused kernel -------------------------------

def _shift_rows(x, s):
  """result[r] = x[r + s]; rows past the end wrap, callers never read them."""
  if s == 0:
    return x
  return jnp.concatenate([x[s:], x[:s]], axis=0)


def _conv2x2(x, w_ref, b_ref, si, sj):
  """2x2 conv with the 4 taps packed along K -> a single MXU matmul.

  `x` is a (rows, Cin) f32 value over a flattened per-sample (i, j) grid where
  one i-step is `si` rows and one j-step is `sj` rows.  Each tap is a whole-slab
  row shift (no per-row copies); taps are concatenated along lanes so K = 4*Cin
  and one dot drives the MXU (one bf16 cast per conv).  Rows whose taps run off
  the valid region produce garbage that downstream code never reads.
  """
  cols = jnp.concatenate(
      [x, _shift_rows(x, sj), _shift_rows(x, si), _shift_rows(x, si + sj)],
      axis=-1).astype(MATMUL_DTYPE)
  return jnp.dot(cols, w_ref[...], preferred_element_type=jnp.float32) + b_ref[...]


def _fused_rew_kernel(
    # inputs
    obs_ref, act_in_ref,
    cw1_ref, cb1_ref, cw2_ref, cb2_ref, cw3_ref, cb3_ref,
    w1i_ref, w1a_ref, b1_ref, w2_ref, b2_ref, w3_ref, b3_ref,
    # outputs
    out_ref,
    # scratch (VMEM)
    a3_ref,
    *, dims):
  Bb, H, W = dims["B"], dims["H"], dims["W"]
  H3, W3, C3 = dims["H3"], dims["W3"], dims["C3"]
  adim = dims["adim"]
  HWg = H * W
  f32 = jnp.float32
  mxu = MATMUL_DTYPE

  # The whole conv stack runs on the full flattened (b, i, j) grid: shifted taps
  # are whole-slab row shifts, the stride-2 max-pool never compacts (its
  # subsampling becomes doubled shifts for conv2/conv3), and only the valid
  # rows are read back for the MLP head.

  # conv1 (3 -> 16) + ReLU
  a1 = jnp.maximum(_conv2x2(obs_ref[...], cw1_ref, cb1_ref, W, 1), 0.0)

  # MaxPool2d(2, 2): vectorized elementwise max over the 4 window taps.
  pm = jnp.maximum(jnp.maximum(a1, _shift_rows(a1, 1)),
                   jnp.maximum(_shift_rows(a1, W), _shift_rows(a1, W + 1)))

  # conv2 (16 -> 32) + ReLU and conv3 (32 -> 64) + Tanh: stride-2 taps on the
  # original grid; valid outputs sit at even (i, j) positions.
  a2 = jnp.maximum(_conv2x2(pm, cw2_ref, cb2_ref, 2 * W, 2), 0.0)
  a3_ref[...] = jnp.tanh(_conv2x2(a2, cw3_ref, cb3_ref, 2 * W, 2))

  # ---- MLP head: NCHW flatten + action concat folded into fc1 --------------
  if adim == 1:
    h = act_in_ref[...] * w1a_ref[...] + b1_ref[...]          # rank-1 VPU update
  else:
    h = jnp.dot(act_in_ref[...], w1a_ref[...],
                preferred_element_type=f32) + b1_ref[...]
  # One (Bb, C3) @ (C3, hidden) matmul per valid spatial position; w1i_ref is
  # p-major so each weight block is contiguous.  HW3 == 1 for 7x7 MiniGrid
  # inputs, so this static loop is normally a single iteration.
  for p in range(H3 * W3):
    oi, oj = p // W3, p % W3
    row0 = (2 * oi) * W + 2 * oj                # valid conv3 row of sample 0
    xp = a3_ref[pl.ds(row0, Bb, stride=HWg), :]  # (Bb, C3): one row per sample
    h = h + jnp.dot(xp.astype(mxu), w1i_ref[pl.ds(p * C3, C3), :],
                    preferred_element_type=f32)
  h = jnp.tanh(h)
  h = jnp.tanh(jnp.dot(h.astype(mxu), w2_ref[...],
                       preferred_element_type=f32) + b2_ref[...])
  # fc3 (hidden -> 1): VPU multiply + lane reduction (avoids an N=1 MXU matmul).
  y = jnp.sum(h * w3_ref[...], axis=-1, keepdims=True) + b3_ref[...]
  out_ref[...] = jax.nn.sigmoid(y)


# ----------------------------- parameter init ------------------------------

def init_rew_model_params(key, obs_space, action_dim=1, hidden_dim=32):
  n, m = obs_space['image'][0], obs_space['image'][1]
  H3 = (n - 1) // 2 - 2
  W3 = (m - 1) // 2 - 2
  C3 = 64
  emb = H3 * W3 * C3  # image_embedding_size

  keys = jax.random.split(key, 6)

  def conv_init(k, cout, cin, kh, kw):
    # PyTorch default Conv2d init (init_params does not touch convs).
    fan_in = cin * kh * kw
    bound = 1.0 / math.sqrt(fan_in)
    kw_, kb_ = jax.random.split(k)
    w = jax.random.uniform(kw_, (cout, cin, kh, kw), jnp.float32, -bound, bound)
    b = jax.random.uniform(kb_, (cout,), jnp.float32, -bound, bound)
    return w, b

  def linear_init(k, out_f, in_f):
    # matches init_params: N(0,1) rows normalized to unit L2 norm, bias = 0.
    w = jax.random.normal(k, (out_f, in_f), jnp.float32)
    w = w / jnp.sqrt(jnp.sum(w * w, axis=1, keepdims=True))
    return w, jnp.zeros((out_f,), jnp.float32)

  c1w, c1b = conv_init(keys[0], 16, 3, 2, 2)
  c2w, c2b = conv_init(keys[1], 32, 16, 2, 2)
  c3w, c3b = conv_init(keys[2], 64, 32, 2, 2)
  l1w, l1b = linear_init(keys[3], hidden_dim, emb + action_dim)
  l2w, l2b = linear_init(keys[4], hidden_dim, hidden_dim)
  l3w, l3b = linear_init(keys[5], 1, hidden_dim)

  def conv_packed(w):
    # torch (cout, cin, 2, 2) -> (4*cin, cout); K index = (di*2 + dj)*cin + c,
    # matching the in-kernel lane order [tap00 | tap01 | tap10 | tap11].
    cout, cin = w.shape[0], w.shape[1]
    return jnp.transpose(w, (2, 3, 1, 0)).reshape(4 * cin, cout).astype(MATMUL_DTYPE)

  # fc1 image weight permuted to p-major (C3, hidden) blocks: row p*C3 + c of
  # w1i corresponds to flattened-NCHW input feature c*HW3 + p of the torch fc1.
  HW3 = H3 * W3
  w1_img = l1w[:, :emb].T.reshape(C3, HW3, hidden_dim)
  w1_img = jnp.transpose(w1_img, (1, 0, 2)).reshape(HW3 * C3, hidden_dim)

  params = dict(
      cw1=conv_packed(c1w), cb1=c1b.reshape(1, -1),
      cw2=conv_packed(c2w), cb2=c2b.reshape(1, -1),
      cw3=conv_packed(c3w), cb3=c3b.reshape(1, -1),
      w1i=w1_img.astype(MATMUL_DTYPE),          # (HW3*C3, hidden) bf16, p-major
      w1a=l1w[:, emb:].T,                       # (action_dim, hidden) f32
      b1=l1b.reshape(1, -1),
      w2=l2w.T.astype(MATMUL_DTYPE), b2=l2b.reshape(1, -1),
      w3=l3w, b3=l3b.reshape(1, -1),            # fc3 kept f32 (VPU reduce)
  )
  raw = dict(c1w=c1w, c1b=c1b, c2w=c2w, c2b=c2b, c3w=c3w, c3b=c3b,
             l1w=l1w, l1b=l1b, l2w=l2w, l2b=l2b, l3w=l3w, l3b=l3b)
  return params, raw


# -------------------------------- forward ----------------------------------

def rew_model_forward(params, obs, action, memory):
  # obs: (B, H, W, 3) float32 NHWC (torch forward transposes this to NCHW).
  B, H, W, C0 = obs.shape
  adim = params['w1a'].shape[0]
  hidden = params['w2'].shape[0]
  C3 = params['cw3'].shape[1]
  H3 = (H - 1) // 2 - 2
  W3 = (W - 1) // 2 - 2

  # Batch blocking: one grid step for small B (v5e/v6e: no per-step overhead);
  # for large, 16-divisible B use two blocks so both v7x TensorCores are fed
  # while keeping every block row-count a multiple of 8 (BlockSpec-legal).
  if B % 16 == 0 and B * H * W > 4096:
    Bb = B // 2
  else:
    Bb = B
  nb = B // Bb

  dims = dict(B=Bb, H=H, W=W, H3=H3, W3=W3, C3=C3, adim=adim)
  obs2d = obs.reshape(B * H * W, C0)  # metadata-only reshape (row-major)

  weights = (params['cw1'], params['cb1'], params['cw2'], params['cb2'],
             params['cw3'], params['cb3'], params['w1i'], params['w1a'],
             params['b1'], params['w2'], params['b2'], params['w3'],
             params['b3'])

  in_specs = [
      pl.BlockSpec((Bb * H * W, C0), lambda i: (i, 0)),   # obs rows (batch-major)
      pl.BlockSpec((Bb, adim), lambda i: (i, 0)),         # action
  ] + [pl.BlockSpec(w.shape, lambda i: (0, 0)) for w in weights]
  out_specs = pl.BlockSpec((Bb, 1), lambda i: (i, 0))

  flops = (2 * B * H * W * 4 * (3 * 16 + 16 * 32 + 32 * 64)
           + 2 * B * (H3 * W3 * C3 * hidden + hidden * hidden + hidden))
  transcendentals = B * H * W * C3 + B * (2 * hidden + 1)
  bytes_accessed = sum(int(a.size) * a.dtype.itemsize
                       for a in (obs2d, action) + weights) + B * 4

  y = pl.pallas_call(
      functools.partial(_fused_rew_kernel, dims=dims),
      out_shape=jax.ShapeDtypeStruct((B, 1), jnp.float32),
      grid_spec=pltpu.PrefetchScalarGridSpec(
          num_scalar_prefetch=0,
          grid=(nb,),
          in_specs=in_specs,
          out_specs=out_specs,
          scratch_shapes=[pltpu.VMEM((Bb * H * W, C3), jnp.float32)]),
      compiler_params=pltpu.CompilerParams(
          dimension_semantics=("parallel",)),
      cost_estimate=pl.CostEstimate(flops=int(flops),
                                    transcendentals=int(transcendentals),
                                    bytes_accessed=int(bytes_accessed)),
  )(obs2d, action, *weights)

  # use_memory=False: memory is passed through unchanged.
  return y, memory


# ------------------------- pure-JAX f32 reference --------------------------

def rew_model_reference(raw, obs, action):
  def conv(x, w, b):
    y = jax.lax.conv_general_dilated(
        x, jnp.transpose(w, (2, 3, 1, 0)), (1, 1), 'VALID',
        dimension_numbers=('NHWC', 'HWIO', 'NHWC'))
    return y + b.reshape(1, 1, 1, -1)
  x = jax.nn.relu(conv(obs, raw['c1w'], raw['c1b']))
  x = jax.lax.reduce_window(x, -jnp.inf, jax.lax.max,
                            (1, 2, 2, 1), (1, 2, 2, 1), 'VALID')
  x = jax.nn.relu(conv(x, raw['c2w'], raw['c2b']))
  x = jnp.tanh(conv(x, raw['c3w'], raw['c3b']))
  x = jnp.transpose(x, (0, 3, 1, 2)).reshape(x.shape[0], -1)   # NCHW flatten
  e = jnp.concatenate([x, action], axis=1)
  h = jnp.tanh(e @ raw['l1w'].T + raw['l1b'])
  h = jnp.tanh(h @ raw['l2w'].T + raw['l2b'])
  return jax.nn.sigmoid(h @ raw['l3w'].T + raw['l3b'])


# TODO(synk): use_memory (LSTMCell) and use_text (Embedding + GRU) branches are
# disabled by the module defaults and are not implemented here.

if __name__ == "__main__":
  B, n, m = 2, 7, 7                 # small MiniGrid-style image
  action_dim, hidden_dim = 1, 32    # hidden_dim kept small for the demo
  obs_space = {'image': (n, m, 3)}
  image_embedding_size = ((n - 1) // 2 - 2) * ((m - 1) // 2 - 2) * 64  # = 64

  key = jax.random.PRNGKey(0)
  k_params, k_obs, k_act, k_mem = jax.random.split(key, 4)
  params, raw = init_rew_model_params(k_params, obs_space, action_dim, hidden_dim)

  obs = jax.random.uniform(k_obs, (B, n, m, 3), jnp.float32, 0.0, 10.0)
  action = jax.random.normal(k_act, (B, action_dim), jnp.float32)
  memory = jax.random.normal(k_mem, (B, 2 * image_embedding_size), jnp.float32)

  fwd = jax.jit(rew_model_forward)
  y, mem_out = fwd(params, obs, action, memory)
  jax.block_until_ready((y, mem_out))

  y_ref = rew_model_reference(raw, obs, action)
  max_err = float(jnp.max(jnp.abs(y - y_ref)))

  assert y.shape == (B, 1)
  assert mem_out.shape == (B, 2 * image_embedding_size)
  assert bool(jnp.all(jnp.isfinite(y)))
  assert bool(jnp.all((y >= 0.0) & (y <= 1.0)))
  assert max_err < 8e-2, f"mismatch vs f32 reference: {max_err}"
  print("KERNEL_OK")
</pallas_src>

<mosaic_0001>
module attributes {stable_mosaic.version = 11 : i64} {
  func.func @_fused_rew_kernel(%arg0: i32, %arg1: memref<98x3xf32, #tpu.memory_space<vmem>>, %arg2: memref<2x1xf32, #tpu.memory_space<vmem>>, %arg3: memref<12x16xbf16, #tpu.memory_space<vmem>>, %arg4: memref<1x16xf32, #tpu.memory_space<vmem>>, %arg5: memref<64x32xbf16, #tpu.memory_space<vmem>>, %arg6: memref<1x32xf32, #tpu.memory_space<vmem>>, %arg7: memref<128x64xbf16, #tpu.memory_space<vmem>>, %arg8: memref<1x64xf32, #tpu.memory_space<vmem>>, %arg9: memref<64x32xbf16, #tpu.memory_space<vmem>>, %arg10: memref<1x32xf32, #tpu.memory_space<vmem>>, %arg11: memref<1x32xf32, #tpu.memory_space<vmem>>, %arg12: memref<32x32xbf16, #tpu.memory_space<vmem>>, %arg13: memref<1x32xf32, #tpu.memory_space<vmem>>, %arg14: memref<1x32xf32, #tpu.memory_space<vmem>>, %arg15: memref<1x1xf32, #tpu.memory_space<vmem>>, %arg16: memref<2x1xf32, #tpu.memory_space<vmem>>, %arg17: memref<98x64xf32, #tpu.memory_space<vmem>>) attributes {dimension_semantics = [#tpu.dimension_semantics<parallel>], iteration_bounds = array<i64: 1>, scalar_prefetch = 0 : i64, scratch_operands = 1 : i64, tpu.core_type = #tpu.core_type<tc>, window_params = [{transform_indices = @transform_0, window_bounds = array<i64: 98, 3>}, {transform_indices = @transform_1, window_bounds = array<i64: 2, 1>}, {pipeline_mode = #tpu.pipeline_mode<synchronous>, transform_indices = @transform_2, window_bounds = array<i64: 12, 16>}, {pipeline_mode = #tpu.pipeline_mode<synchronous>, transform_indices = @transform_3, window_bounds = array<i64: 1, 16>}, {pipeline_mode = #tpu.pipeline_mode<synchronous>, transform_indices = @transform_4, window_bounds = array<i64: 64, 32>}, {pipeline_mode = #tpu.pipeline_mode<synchronous>, transform_indices = @transform_5, window_bounds = array<i64: 1, 32>}, {pipeline_mode = #tpu.pipeline_mode<synchronous>, transform_indices = @transform_6, window_bounds = array<i64: 128, 64>}, {pipeline_mode = #tpu.pipeline_mode<synchronous>, transform_indices = @transform_7, window_bounds = array<i64: 1, 64>}, {pipeline_mode = #tpu.pipeline_mode<synchronous>, transform_indices = @transform_8, window_bounds = array<i64: 64, 32>}, {pipeline_mode = #tpu.pipeline_mode<synchronous>, transform_indices = @transform_9, window_bounds = array<i64: 1, 32>}, {pipeline_mode = #tpu.pipeline_mode<synchronous>, transform_indices = @transform_10, window_bounds = array<i64: 1, 32>}, {pipeline_mode = #tpu.pipeline_mode<synchronous>, transform_indices = @transform_11, window_bounds = array<i64: 32, 32>}, {pipeline_mode = #tpu.pipeline_mode<synchronous>, transform_indices = @transform_12, window_bounds = array<i64: 1, 32>}, {pipeline_mode = #tpu.pipeline_mode<synchronous>, transform_indices = @transform_13, window_bounds = array<i64: 1, 32>}, {pipeline_mode = #tpu.pipeline_mode<synchronous>, transform_indices = @transform_14, window_bounds = array<i64: 1, 1>}, {transform_indices = @transform_15, window_bounds = array<i64: 2, 1>}]} {
    %c0 = arith.constant 0 : index
    %c0_0 = arith.constant 0 : index
    %0 = vector.load %arg1[%c0, %c0_0] : memref<98x3xf32, #tpu.memory_space<vmem>>, vector<98x3xf32>
    %1 = vector.extract_strided_slice %0 {offsets = [1, 0], sizes = [97, 3], strides = [1, 1]} : vector<98x3xf32> to vector<97x3xf32>
    %2 = vector.extract_strided_slice %0 {offsets = [0, 0], sizes = [1, 3], strides = [1, 1]} : vector<98x3xf32> to vector<1x3xf32>
    %3 = tpu.concatenate %1, %2 in 0 : vector<97x3xf32>, vector<1x3xf32> -> vector<98x3xf32>
    %4 = vector.extract_strided_slice %0 {offsets = [7, 0], sizes = [91, 3], strides = [1, 1]} : vector<98x3xf32> to vector<91x3xf32>
    %5 = vector.extract_strided_slice %0 {offsets = [0, 0], sizes = [7, 3], strides = [1, 1]} : vector<98x3xf32> to vector<7x3xf32>
    %6 = tpu.concatenate %4, %5 in 0 : vector<91x3xf32>, vector<7x3xf32> -> vector<98x3xf32>
    %7 = vector.extract_strided_slice %0 {offsets = [8, 0], sizes = [90, 3], strides = [1, 1]} : vector<98x3xf32> to vector<90x3xf32>
    %8 = vector.extract_strided_slice %0 {offsets = [0, 0], sizes = [8, 3], strides = [1, 1]} : vector<98x3xf32> to vector<8x3xf32>
    %9 = tpu.concatenate %7, %8 in 0 : vector<90x3xf32>, vector<8x3xf32> -> vector<98x3xf32>
    %10 = tpu.concatenate %0, %3, %6, %9 in 1 : vector<98x3xf32>, vector<98x3xf32>, vector<98x3xf32>, vector<98x3xf32> -> vector<98x12xf32>
    %11 = arith.truncf %10 : vector<98x12xf32> to vector<98x12xbf16>
    %c0_1 = arith.constant 0 : index
    %c0_2 = arith.constant 0 : index
    %12 = vector.load %arg3[%c0_1, %c0_2] : memref<12x16xbf16, #tpu.memory_space<vmem>>, vector<12x16xbf16>
    %cst = arith.constant dense<0.000000e+00> : vector<98x16xf32>
    %13 = tpu.matmul %11, %12, %cst {dimension_numbers = #tpu.dot_dimension_numbers<[1], [0], [0], [1], [0, 0, 1, 1], [], []>} : vector<98x12xbf16>, vector<12x16xbf16>, vector<98x16xf32> -> vector<98x16xf32>
    %c0_3 = arith.constant 0 : index
    %c0_4 = arith.constant 0 : index
    %14 = vector.load %arg4[%c0_3, %c0_4] : memref<1x16xf32, #tpu.memory_space<vmem>>, vector<1x16xf32>
    %15 = vector.broadcast %14 : vector<1x16xf32> to vector<98x16xf32>
    %16 = arith.addf %13, %15 : vector<98x16xf32>
    %cst_5 = arith.constant 0.000000e+00 : f32
    %17 = vector.broadcast %cst_5 : f32 to vector<98x16xf32>
    %18 = arith.maximumf %16, %17 : vector<98x16xf32>
    %19 = vector.extract_strided_slice %18 {offsets = [1, 0], sizes = [97, 16], strides = [1, 1]} : vector<98x16xf32> to vector<97x16xf32>
    %20 = vector.extract_strided_slice %18 {offsets = [0, 0], sizes = [1, 16], strides = [1, 1]} : vector<98x16xf32> to vector<1x16xf32>
    %21 = tpu.concatenate %19, %20 in 0 : vector<97x16xf32>, vector<1x16xf32> -> vector<98x16xf32>
    %22 = arith.maximumf %18, %21 : vector<98x16xf32>
    %23 = vector.extract_strided_slice %18 {offsets = [7, 0], sizes = [91, 16], strides = [1, 1]} : vector<98x16xf32> to vector<91x16xf32>
    %24 = vector.extract_strided_slice %18 {offsets = [0, 0], sizes = [7, 16], strides = [1, 1]} : vector<98x16xf32> to vector<7x16xf32>
    %25 = tpu.concatenate %23, %24 in 0 : vector<91x16xf32>, vector<7x16xf32> -> vector<98x16xf32>
    %26 = vector.extract_strided_slice %18 {offsets = [8, 0], sizes = [90, 16], strides = [1, 1]} : vector<98x16xf32> to vector<90x16xf32>
    %27 = vector.extract_strided_slice %18 {offsets = [0, 0], sizes = [8, 16], strides = [1, 1]} : vector<98x16xf32> to vector<8x16xf32>
    %28 = tpu.concatenate %26, %27 in 0 : vector<90x16xf32>, vector<8x16xf32> -> vector<98x16xf32>
    %29 = arith.maximumf %25, %28 : vector<98x16xf32>
    %30 = arith.maximumf %22, %29 : vector<98x16xf32>
    %31 = vector.extract_strided_slice %30 {offsets = [2, 0], sizes = [96, 16], strides = [1, 1]} : vector<98x16xf32> to vector<96x16xf32>
    %32 = vector.extract_strided_slice %30 {offsets = [0, 0], sizes = [2, 16], strides = [1, 1]} : vector<98x16xf32> to vector<2x16xf32>
    %33 = tpu.concatenate %31, %32 in 0 : vector<96x16xf32>, vector<2x16xf32> -> vector<98x16xf32>
    %34 = vector.extract_strided_slice %30 {offsets = [14, 0], sizes = [84, 16], strides = [1, 1]} : vector<98x16xf32> to vector<84x16xf32>
    %35 = vector.extract_strided_slice %30 {offsets = [0, 0], sizes = [14, 16], strides = [1, 1]} : vector<98x16xf32> to vector<14x16xf32>
    %36 = tpu.concatenate %34, %35 in 0 : vector<84x16xf32>, vector<14x16xf32> -> vector<98x16xf32>
    %37 = vector.extract_strided_slice %30 {offsets = [16, 0], sizes = [82, 16], strides = [1, 1]} : vector<98x16xf32> to vector<82x16xf32>
    %38 = vector.extract_strided_slice %30 {offsets = [0, 0], sizes = [16, 16], strides = [1, 1]} : vector<98x16xf32> to vector<16x16xf32>
    %39 = tpu.concatenate %37, %38 in 0 : vector<82x16xf32>, vector<16x16xf32> -> vector<98x16xf32>
    %40 = tpu.concatenate %30, %33, %36, %39 in 1 : vector<98x16xf32>, vector<98x16xf32>, vector<98x16xf32>, vector<98x16xf32> -> vector<98x64xf32>
    %41 = arith.truncf %40 : vector<98x64xf32> to vector<98x64xbf16>
    %c0_6 = arith.constant 0 : index
    %c0_7 = arith.constant 0 : index
    %42 = vector.load %arg5[%c0_6, %c0_7] : memref<64x32xbf16, #tpu.memory_space<vmem>>, vector<64x32xbf16>
    %cst_8 = arith.constant dense<0.000000e+00> : vector<98x32xf32>
    %43 = tpu.matmul %41, %42, %cst_8 {dimension_numbers = #tpu.dot_dimension_numbers<[1], [0], [0], [1], [0, 0, 1, 1], [], []>} : vector<98x64xbf16>, vector<64x32xbf16>, vector<98x32xf32> -> vector<98x32xf32>
    %c0_9 = arith.constant 0 : index
    %c0_10 = arith.constant 0 : index
    %44 = vector.load %arg6[%c0_9, %c0_10] : memref<1x32xf32, #tpu.memory_space<vmem>>, vector<1x32xf32>
    %45 = vector.broadcast %44 : vector<1x32xf32> to vector<98x32xf32>
    %46 = arith.addf %43, %45 : vector<98x32xf32>
    %cst_11 = arith.constant 0.000000e+00 : f32
    %47 = vector.broadcast %cst_11 : f32 to vector<98x32xf32>
    %48 = arith.maximumf %46, %47 : vector<98x32xf32>
    %49 = vector.extract_strided_slice %48 {offsets = [2, 0], sizes = [96, 32], strides = [1, 1]} : vector<98x32xf32> to vector<96x32xf32>
    %50 = vector.extract_strided_slice %48 {offsets = [0, 0], sizes = [2, 32], strides = [1, 1]} : vector<98x32xf32> to vector<2x32xf32>
    %51 = tpu.concatenate %49, %50 in 0 : vector<96x32xf32>, vector<2x32xf32> -> vector<98x32xf32>
    %52 = vector.extract_strided_slice %48 {offsets = [14, 0], sizes = [84, 32], strides = [1, 1]} : vector<98x32xf32> to vector<84x32xf32>
    %53 = vector.extract_strided_slice %48 {offsets = [0, 0], sizes = [14, 32], strides = [1, 1]} : vector<98x32xf32> to vector<14x32xf32>
    %54 = tpu.concatenate %52, %53 in 0 : vector<84x32xf32>, vector<14x32xf32> -> vector<98x32xf32>
    %55 = vector.extract_strided_slice %48 {offsets = [16, 0], sizes = [82, 32], strides = [1, 1]} : vector<98x32xf32> to vector<82x32xf32>
    %56 = vector.extract_strided_slice %48 {offsets = [0, 0], sizes = [16, 32], strides = [1, 1]} : vector<98x32xf32> to vector<16x32xf32>
    %57 = tpu.concatenate %55, %56 in 0 : vector<82x32xf32>, vector<16x32xf32> -> vector<98x32xf32>
    %58 = tpu.concatenate %48, %51, %54, %57 in 1 : vector<98x32xf32>, vector<98x32xf32>, vector<98x32xf32>, vector<98x32xf32> -> vector<98x128xf32>
    %59 = arith.truncf %58 : vector<98x128xf32> to vector<98x128xbf16>
    %c0_12 = arith.constant 0 : index
    %c0_13 = arith.constant 0 : index
    %60 = vector.load %arg7[%c0_12, %c0_13] : memref<128x64xbf16, #tpu.memory_space<vmem>>, vector<128x64xbf16>
    %cst_14 = arith.constant dense<0.000000e+00> : vector<98x64xf32>
    %61 = tpu.matmul %59, %60, %cst_14 {dimension_numbers = #tpu.dot_dimension_numbers<[1], [0], [0], [1], [0, 0, 1, 1], [], []>} : vector<98x128xbf16>, vector<128x64xbf16>, vector<98x64xf32> -> vector<98x64xf32>
    %c0_15 = arith.constant 0 : index
    %c0_16 = arith.constant 0 : index
    %62 = vector.load %arg8[%c0_15, %c0_16] : memref<1x64xf32, #tpu.memory_space<vmem>>, vector<1x64xf32>
    %63 = vector.broadcast %62 : vector<1x64xf32> to vector<98x64xf32>
    %64 = arith.addf %61, %63 : vector<98x64xf32>
    %65 = math.tanh %64 : vector<98x64xf32>
    %c0_17 = arith.constant 0 : index
    %c0_18 = arith.constant 0 : index
    %66 = vector.load %arg17[%c0_17, %c0_18] : memref<98x64xf32, #tpu.memory_space<vmem>>, vector<98x64xf32>
    tpu.vector_store %arg17[%c0_17, %c0_18], %65 {strides = array<i32>} : memref<98x64xf32, #tpu.memory_space<vmem>>, vector<98x64xf32>,
    %c0_19 = arith.constant 0 : index
    %c0_20 = arith.constant 0 : index
    %67 = vector.load %arg2[%c0_19, %c0_20] : memref<2x1xf32, #tpu.memory_space<vmem>>, vector<2x1xf32>
    %c0_21 = arith.constant 0 : index
    %c0_22 = arith.constant 0 : index
    %68 = vector.load %arg10[%c0_21, %c0_22] : memref<1x32xf32, #tpu.memory_space<vmem>>, vector<1x32xf32>
    %69 = vector.broadcast %67 : vector<2x1xf32> to vector<2x32xf32>
    %70 = vector.broadcast %68 : vector<1x32xf32> to vector<2x32xf32>
    %71 = arith.mulf %69, %70 : vector<2x32xf32>
    %c0_23 = arith.constant 0 : index
    %c0_24 = arith.constant 0 : index
    %72 = vector.load %arg11[%c0_23, %c0_24] : memref<1x32xf32, #tpu.memory_space<vmem>>, vector<1x32xf32>
    %73 = vector.broadcast %72 : vector<1x32xf32> to vector<2x32xf32>
    %74 = arith.addf %71, %73 : vector<2x32xf32>
    %c0_25 = arith.constant 0 : index
    %c0_26 = arith.constant 0 : index
    %75 = tpu.strided_load %arg17[%c0_25, %c0_26] {strides = array<i32: 49, 1>} : memref<98x64xf32, #tpu.memory_space<vmem>>, vector<2x64xf32>
    %76 = arith.truncf %75 : vector<2x64xf32> to vector<2x64xbf16>
    %c0_27 = arith.constant 0 : index
    %c0_28 = arith.constant 0 : index
    %77 = vector.load %arg9[%c0_27, %c0_28] : memref<64x32xbf16, #tpu.memory_space<vmem>>, vector<64x32xbf16>
    %cst_29 = arith.constant dense<0.000000e+00> : vector<2x32xf32>
    %78 = tpu.matmul %76, %77, %cst_29 {dimension_numbers = #tpu.dot_dimension_numbers<[1], [0], [0], [1], [0, 0, 1, 1], [], []>} : vector<2x64xbf16>, vector<64x32xbf16>, vector<2x32xf32> -> vector<2x32xf32>
    %79 = arith.addf %74, %78 : vector<2x32xf32>
    %80 = math.tanh %79 : vector<2x32xf32>
    %81 = arith.truncf %80 : vector<2x32xf32> to vector<2x32xbf16>
    %c0_30 = arith.constant 0 : index
    %c0_31 = arith.constant 0 : index
    %82 = vector.load %arg12[%c0_30, %c0_31] : memref<32x32xbf16, #tpu.memory_space<vmem>>, vector<32x32xbf16>
    %cst_32 = arith.constant dense<0.000000e+00> : vector<2x32xf32>
    %83 = tpu.matmul %81, %82, %cst_32 {dimension_numbers = #tpu.dot_dimension_numbers<[1], [0], [0], [1], [0, 0, 1, 1], [], []>} : vector<2x32xbf16>, vector<32x32xbf16>, vector<2x32xf32> -> vector<2x32xf32>
    %c0_33 = arith.constant 0 : index
    %c0_34 = arith.constant 0 : index
    %84 = vector.load %arg13[%c0_33, %c0_34] : memref<1x32xf32, #tpu.memory_space<vmem>>, vector<1x32xf32>
    %85 = vector.broadcast %84 : vector<1x32xf32> to vector<2x32xf32>
    %86 = arith.addf %83, %85 : vector<2x32xf32>
    %87 = math.tanh %86 : vector<2x32xf32>
    %c0_35 = arith.constant 0 : index
    %c0_36 = arith.constant 0 : index
    %88 = vector.load %arg14[%c0_35, %c0_36] : memref<1x32xf32, #tpu.memory_space<vmem>>, vector<1x32xf32>
    %89 = vector.broadcast %88 : vector<1x32xf32> to vector<2x32xf32>
    %90 = arith.mulf %87, %89 : vector<2x32xf32>
    %cst_37 = arith.constant dense<0.000000e+00> : vector<2xf32>
    %91 = vector.multi_reduction <add>, %90, %cst_37 [1] : vector<2x32xf32> to vector<2xf32>
    %92 = vector.shape_cast %91 : vector<2xf32> to vector<2x1xf32>
    %c0_38 = arith.constant 0 : index
    %c0_39 = arith.constant 0 : index
    %93 = vector.load %arg15[%c0_38, %c0_39] : memref<1x1xf32, #tpu.memory_space<vmem>>, vector<1x1xf32>
    %94 = vector.broadcast %93 : vector<1x1xf32> to vector<2x1xf32>
    %95 = arith.addf %92, %94 : vector<2x1xf32>
    %96 = arith.negf %95 : vector<2x1xf32>
    %97 = math.exp %96 : vector<2x1xf32>
    %cst_40 = arith.constant 1.000000e+00 : f32
    %98 = vector.broadcast %cst_40 : f32 to vector<2x1xf32>
    %99 = arith.addf %98, %97 : vector<2x1xf32>
    %100 = arith.divf %98, %99 : vector<2x1xf32>
    %c0_41 = arith.constant 0 : index
    %c0_42 = arith.constant 0 : index
    %101 = vector.load %arg16[%c0_41, %c0_42] : memref<2x1xf32, #tpu.memory_space<vmem>>, vector<2x1xf32>
    tpu.vector_store %arg16[%c0_41, %c0_42], %100 {strides = array<i32>} : memref<2x1xf32, #tpu.memory_space<vmem>>, vector<2x1xf32>,
    return
  }
  func.func @transform_0(%arg0: i32) -> (i32, i32) {
    %c0_i32 = arith.constant 0 : i32
    %c0_i32_0 = arith.constant 0 : i32
    return %arg0, %c0_i32 : i32, i32
  }
  func.func @transform_1(%arg0: i32) -> (i32, i32) {
    %c0_i32 = arith.constant 0 : i32
    %c0_i32_0 = arith.constant 0 : i32
    return %arg0, %c0_i32 : i32, i32
  }
  func.func @transform_2(%arg0: i32) -> (i32, i32) {
    %c0_i32 = arith.constant 0 : i32
    %c0_i32_0 = arith.constant 0 : i32
    %c0_i32_1 = arith.constant 0 : i32
    return %c0_i32, %c0_i32_0 : i32, i32
  }
  func.func @transform_3(%arg0: i32) -> (i32, i32) {
    %c0_i32 = arith.constant 0 : i32
    %c0_i32_0 = arith.constant 0 : i32
    %c0_i32_1 = arith.constant 0 : i32
    return %c0_i32, %c0_i32_0 : i32, i32
  }
  func.func @transform_4(%arg0: i32) -> (i32, i32) {
    %c0_i32 = arith.constant 0 : i32
    %c0_i32_0 = arith.constant 0 : i32
    %c0_i32_1 = arith.constant 0 : i32
    return %c0_i32, %c0_i32_0 : i32, i32
  }
  func.func @transform_5(%arg0: i32) -> (i32, i32) {
    %c0_i32 = arith.constant 0 : i32
    %c0_i32_0 = arith.constant 0 : i32
    %c0_i32_1 = arith.constant 0 : i32
    return %c0_i32, %c0_i32_0 : i32, i32
  }
  func.func @transform_6(%arg0: i32) -> (i32, i32) {
    %c0_i32 = arith.constant 0 : i32
    %c0_i32_0 = arith.constant 0 : i32
    %c0_i32_1 = arith.constant 0 : i32
    return %c0_i32, %c0_i32_0 : i32, i32
  }
  func.func @transform_7(%arg0: i32) -> (i32, i32) {
    %c0_i32 = arith.constant 0 : i32
    %c0_i32_0 = arith.constant 0 : i32
    %c0_i32_1 = arith.constant 0 : i32
    return %c0_i32, %c0_i32_0 : i32, i32
  }
  func.func @transform_8(%arg0: i32) -> (i32, i32) {
    %c0_i32 = arith.constant 0 : i32
    %c0_i32_0 = arith.constant 0 : i32
    %c0_i32_1 = arith.constant 0 : i32
    return %c0_i32, %c0_i32_0 : i32, i32
  }
  func.func @transform_9(%arg0: i32) -> (i32, i32) {
    %c0_i32 = arith.constant 0 : i32
    %c0_i32_0 = arith.constant 0 : i32
    %c0_i32_1 = arith.constant 0 : i32
    return %c0_i32, %c0_i32_0 : i32, i32
  }
  func.func @transform_10(%arg0: i32) -> (i32, i32) {
    %c0_i32 = arith.constant 0 : i32
    %c0_i32_0 = arith.constant 0 : i32
    %c0_i32_1 = arith.constant 0 : i32
    return %c0_i32, %c0_i32_0 : i32, i32
  }
  func.func @transform_11(%arg0: i32) -> (i32, i32) {
    %c0_i32 = arith.constant 0 : i32
    %c0_i32_0 = arith.constant 0 : i32
    %c0_i32_1 = arith.constant 0 : i32
    return %c0_i32, %c0_i32_0 : i32, i32
  }
  func.func @transform_12(%arg0: i32) -> (i32, i32) {
    %c0_i32 = arith.constant 0 : i32
    %c0_i32_0 = arith.constant 0 : i32
    %c0_i32_1 = arith.constant 0 : i32
    return %c0_i32, %c0_i32_0 : i32, i32
  }
  func.func @transform_13(%arg0: i32) -> (i32, i32) {
    %c0_i32 = arith.constant 0 : i32
    %c0_i32_0 = arith.constant 0 : i32
    %c0_i32_1 = arith.constant 0 : i32
    return %c0_i32, %c0_i32_0 : i32, i32
  }
  func.func @transform_14(%arg0: i32) -> (i32, i32) {
    %c0_i32 = arith.constant 0 : i32
    %c0_i32_0 = arith.constant 0 : i32
    %c0_i32_1 = arith.constant 0 : i32
    return %c0_i32, %c0_i32_0 : i32, i32
  }
  func.func @transform_15(%arg0: i32) -> (i32, i32) {
    %c0_i32 = arith.constant 0 : i32
    %c0_i32_0 = arith.constant 0 : i32
    return %arg0, %c0_i32 : i32, i32
  }
}

</mosaic_0001>

<bundles_post_ra>
// kernel: rew_model_forward.1
= control target key start
LH: loop header
LB: loop body
LE: loop exit
PB: predicated region body
PF: predicated region fallthrough
CT: control target
= control target key end

     0   :  { %vm79_vm0 = vcmask 1046528   ;;  %s1856_s28 = smov 9   ;;  %vm108_vm1 = vcmask 1040384   ;;  %s1857_s18 = smov 3   ;;  %vm137_vm2 = vcmask 1042432   ;;  %vm141_vm3 = vcmask 1041408   ;;  %s2730_s0 = inlined_call_operand.vmem [shape: f32[98,3], index: 0, kind: input, shape index: {}]   ;;  %s2731_s2 = inlined_call_operand.vmem [shape: bf16[12,16], index: 2, kind: input, shape index: {}]   ;;  %s2732_s3 = inlined_call_operand.vmem [shape: f32[1,16], index: 3, kind: input, shape index: {}]   ;;  %s2733_s5 = inlined_call_operand.vmem [shape: f32[1,32], index: 5, kind: input, shape index: {}]   ;;  %s2734_s4 = inlined_call_operand.vmem [shape: bf16[64,32], index: 4, kind: input, shape index: {}]   ;;  %s2735_s7 = inlined_call_operand.vmem [shape: f32[1,64], index: 7, kind: input, shape index: {}]   ;;  %s2736_s6 = inlined_call_operand.vmem [shape: bf16[128,64], index: 6, kind: input, shape index: {}]   ;;  %s2737_s1 = inlined_call_operand.vmem [shape: f32[2,1], index: 1, kind: input, shape index: {}]   ;;  %s2738_s8 = inlined_call_operand.vmem [shape: bf16[64,32], index: 8, kind: input, shape index: {}]   ;;  %s2739_s9 = inlined_call_operand.vmem [shape: f32[1,32], index: 9, kind: input, shape index: {}]   ;;  %s2740_s10 = inlined_call_operand.vmem [shape: f32[1,32], index: 10, kind: input, shape index: {}]   ;;  %s2741_s11 = inlined_call_operand.vmem [shape: bf16[32,32], index: 11, kind: input, shape index: {}]   ;;  %s2742_s12 = inlined_call_operand.vmem [shape: f32[1,32], index: 12, kind: input, shape index: {}]   ;;  %s2743_s13 = inlined_call_operand.vmem [shape: f32[1,32], index: 13, kind: input, shape index: {}]   ;;  %s2744_s14 = inlined_call_operand.<no memory space> [shape: f32[1,1], index: 14, kind: input, shape index: {}]   ;;  %s2745_s15 = inlined_call_operand.vmem [shape: f32[2,1], index: 15, kind: output, shape index: {}]  }
   0x1   :  { %v1948_v0 = vld [vmem:[%s2730_s0] sm:$0xff]  ;;  %v1953_v1 = vld [vmem:[%s2730_s0 + $0x8] sm:$0xff]  ;;  %v1958_v2 = vld [vmem:[%s2730_s0 + $0x10] sm:$0xff]  ;;  %s1858_s19 = smov 6   ;;  %vm345_vm4 = vcmask 1045504   ;;  %vm263_vm5 = vcmask 23552  }
   0x2   :  { %v80_v3 = vrot.slane %v1948_v0, 1  ;;  %v81_v4 = vrot.slane %v1953_v1, 1  ;;  %v83_v5 = vrot.slane %v1958_v2, 1  ;;  %v1553_v6 = vpack.i.bf16 %v1958_v2, %v1953_v1  ;;  %v1968_v7 = vld [vmem:[%s2730_s0 + $0x18] sm:$0xff]  ;;  %v1973_v8 = vld [vmem:[%s2730_s0 + $0x20] sm:$0xff]  ;;  %v1991_v22 = vld [vmem:[%s2730_s0 + $0x28] sm:$0xff] }
   0x3   :  { %v106_v9 = vrot.slane %v1948_v0, 7  ;;  %v110_v10 = vrot.slane %v1953_v1, 7  ;;  %v112_v11 = vrot.slane %v1958_v2, 7  ;;  %v85_v12 = vrot.slane %v1968_v7, 1  ;;  %v1996_v23 = vld [vmem:[%s2730_s0 + $0x30] sm:$0xff]  ;;  %v2015_v36 = vld [vmem:[%s2730_s0 + $0x38] sm:$0xff] }
   0x4   :  { %v82_v13 = vsel %vm79_vm0, %v80_v3, %v81_v4  ;;  %v84_v14 = vsel %vm79_vm0, %v81_v4, %v83_v5  ;;  %1554 = vrot.lane.b32.xlu1 %v1553_v6, %s1856_s28  ;;  %v87_v15 = vrot.slane %v1973_v8, 1  ;;  %v114_v16 = vrot.slane %v1968_v7, 7  ;;  %v2020_v37 = vld [vmem:[%s2730_s0 + $0x40] sm:$0xff]  ;;  %v2038_v49 = vld [vmem:[%s2730_s0 + $0x48] sm:$0xff]  ;;  %v2043_v50 = vld [vmem:[%s2730_s0 + $0x50] sm:$0xff] }
   0x5   :  { %v1543_v17 = vpack.i.bf16 %v84_v14, %v82_v13  ;;  %v86_v18 = vsel %vm79_vm0, %v83_v5, %v85_v12  ;;  %v116_v21 = vrot.slane %v1973_v8, 7  ;;  %v111_v24 = vsel %vm108_vm1, %v106_v9, %v110_v10  ;;  %v2056_v58 = vld [vmem:[%s2730_s0 + $0x58] sm:$0xff]  ;;  %v2061_v59 = vld [vmem:[%s2730_s0 + $0x60] sm:$0x3]  ;;  %s1863_s0 = smov 64  }
   0x6   :  { %v88_v19 = vsel %vm79_vm0, %v85_v12, %v87_v15  ;;  %v115_v20 = vsel %vm108_vm1, %v112_v11, %v114_v16  ;;  %v113_v25 = vsel %vm108_vm1, %v110_v10, %v112_v11  ;;  %v118_v29 = vrot.slane %v1991_v22, 7 }
   0x7   :  { %1544 = vrot.lane.b32.xlu0 %v1543_v17, %s1857_s18  ;;  %v1558_v26 = vpack.i.bf16 %v88_v19, %v86_v18  ;;  %v117_v27 = vsel %vm108_vm1, %v114_v16, %v116_v21  ;;  %v120_v30 = vrot.slane %v1996_v23, 7  ;;  %v1548_v31 = vpack.i.bf16 %v113_v25, %v111_v24 }
   0x8   :  { %v1563_v28 = vpack.i.bf16 %v117_v27, %v115_v20  ;;  %v89_v32 = vrot.slane %v1991_v22, 1  ;;  %v91_v33 = vrot.slane %v1996_v23, 1  ;;  %v119_v34 = vsel %vm108_vm1, %v116_v21, %v118_v29 }
   0x9   :  { %v121_v35 = vsel %vm108_vm1, %v118_v29, %v120_v30  ;;  %v1568_v38 = vpack.i.bf16 %v1973_v8, %v1968_v7  ;;  %v122_v42 = vrot.slane %v2015_v36, 7  ;;  %v124_v43 = vrot.slane %v2020_v37, 7 }
   0xa   :  { %1564 = vrot.lane.b32.xlu2 %v1563_v28, %s1858_s19  ;;  %v90_v39 = vsel %vm79_vm0, %v87_v15, %v89_v32  ;;  %v92_v40 = vsel %vm79_vm0, %v89_v32, %v91_v33  ;;  %v1578_v41 = vpack.i.bf16 %v121_v35, %v119_v34  ;;  %v93_v45 = vrot.slane %v2015_v36, 1 }
   0xb   :  { %v1573_v44 = vpack.i.bf16 %v92_v40, %v90_v39  ;;  %v95_v46 = vrot.slane %v2020_v37, 1  ;;  %v123_v47 = vsel %vm108_vm1, %v120_v30, %v122_v42  ;;  %v125_v48 = vsel %vm108_vm1, %v122_v42, %v124_v43  ;;  %v1416_v30 = vld [vmem:[%s2731_s2] sm:$0xf] }
   0xc   :  { %1559 = vrot.lane.b32.xlu1 %v1558_v26, %s1857_s18  ;;  %v1583_v51 = vpack.i.bf16 %v1996_v23, %v1991_v22  ;;  %v94_v52 = vsel %vm79_vm0, %v91_v33, %v93_v45  ;;  %v1593_v54 = vpack.i.bf16 %v125_v48, %v123_v47  ;;  %v126_v55 = vrot.slane %v2038_v49, 7 }
   0xd   :  { %v96_v53 = vsel %vm79_vm0, %v93_v45, %v95_v46  ;;  %v128_v56 = vrot.slane %v2043_v50, 7  ;;  %v97_v60 = vrot.slane %v2038_v49, 1  ;;  %v99_v61 = vrot.slane %v2043_v50, 1 }
   0xe   :  { %v1588_v57 = vpack.i.bf16 %v96_v53, %v94_v52  ;;  %v127_v62 = vsel %vm108_vm1, %v124_v43, %v126_v55  ;;  %v130_v3 = vrot.slane %v2056_v58, 7  ;;  %v132_v4 = vrot.slane %v2061_v59, 7 }
   0xf   :  { %1549 = vrot.lane.b32.xlu0 %v1548_v31, %s1858_s19  ;;  %v129_v63 = vsel %vm108_vm1, %v126_v55, %v128_v56  ;;  %v1598_v5 = vpack.i.bf16 %v2020_v37, %v2015_v36  ;;  %v98_v6 = vsel %vm79_vm0, %v95_v46, %v97_v60  ;;  %v100_v10 = vsel %vm79_vm0, %v97_v60, %v99_v61  ;;  %v1507_v31 = vld [vmem:[%s2731_s2] sm:$0x30] }
  0x10   :  { %v1608_v11 = vpack.i.bf16 %v129_v63, %v127_v62  ;;  %v135_v12 = vrot.slane %v1948_v0, 5  ;;  %v133_v13 = vsel %vm108_vm1, %v130_v3, %v132_v4  ;;  %v1603_v14 = vpack.i.bf16 %v100_v10, %v98_v6 }
  0x11   :  { %v101_v15 = vrot.slane %v2056_v58, 1  ;;  %v103_v16 = vrot.slane %v2061_v59, 1  ;;  %v131_v17 = vsel %vm108_vm1, %v128_v56, %v130_v3  ;;  %v1613_v19 = vpack.i.bf16 %v2043_v50, %v2038_v49 }
  0x12   :  { %1569 = vrot.lane.b32.xlu2 %v1568_v38, %s1856_s28  ;;  %v138_v18 = vsel %vm137_vm2, %v133_v13, %v135_v12  ;;  %v139_v25 = vrot.slane %v1948_v0, 6  ;;  %v1417_v32 = vor.u32 %v1507_v31, %v1416_v30  ;;  %vm277_vm6 = vcmask 48128  }
  0x13   :  { %v102_v20 = vsel %vm79_vm0, %v99_v61, %v101_v15  ;;  %v104_v21 = vsel %vm79_vm0, %v101_v15, %v103_v16  ;;  %v1623_v24 = vpack.i.bf16 %v138_v18, %v131_v17  ;;  %v109_v29 = vsel %vm108_vm1, %v103_v16, %v106_v9 }
  0x14   :  { %1579 = vrot.lane.b32.xlu1 %v1578_v41, %s1858_s19  ;;  %v1618_v26 = vpack.i.bf16 %v104_v21, %v102_v20  ;;  %v142_v27 = vsel %vm141_vm3, %v2061_v59, %v139_v25  ;;  %v347_v33 = vsel %vm345_vm4, %v1417_v32, 0  ;;  %vm291_vm7 = vcmask 72704  }
  0x15   :  { %v1628_v28 = vpack.i.bf16 %v142_v27, %v2056_v58  ;;  %356 = vmatpush.bf16.msra.mxu0 %v347_v33  ;;  %vm323_vm8 = vcmask 97280   ;;  %vm731_vm9 = vcmask 130048   ;;  %vm745_vm10 = vcmask 261120  }
  0x16   :  { %vm759_vm11 = vcmask 392192   ;;  %vm816_vm12 = vcmask 523264   ;;  %vm602_vm13 = vcmask 1043456   ;;  %vm1110_vm14 = vcmask 785408  }
  0x17   :  { %1574 = vrot.lane.b32.xlu0 %v1573_v44, %s1857_s18  ;;  %vm1380_vm15 = vcmask 254976  }
  0x1a   :  { %1584 = vrot.lane.b32.xlu2 %v1583_v51, %s1856_s28 }
  0x1c   :  { %1594 = vrot.lane.b32.xlu1 %v1593_v54, %s1858_s19 }
  0x1f   :  { %1589 = vrot.lane.b32.xlu0 %v1588_v57, %s1857_s18 }
  0x22   :  { %1599 = vrot.lane.b32.xlu2 %v1598_v5, %s1856_s28 }
  0x24   :  { %1609 = vrot.lane.b32.xlu1 %v1608_v11, %s1858_s19 }
  0x27   :  { %1604 = vrot.lane.b32.xlu0 %v1603_v14, %s1857_s18 }
  0x2a   :  { %1614 = vrot.lane.b32.xlu2 %v1613_v19, %s1856_s28 }
  0x2c   :  { %1624 = vrot.lane.b32.xlu1 %v1623_v24, %s1858_s19 }
  0x2f   :  { %1619 = vrot.lane.b32.xlu0 %v1618_v26, %s1857_s18 }
  0x32   :  { %1629 = vrot.lane.b32.xlu2 %v1628_v28, %s1856_s28 }
  0x34   :  { %208 = vrot.lane.b32.xlu1 %v135_v12, %s1858_s19  ;;  %s1861_s19 = smov 32  }
  0x37   :  { %168 = vrot.lane.b32.xlu0 %v109_v29, %s1857_s18  ;;  %s1860_s18 = smov 48  }
  0x3a   :  { %248 = vrot.lane.b32.xlu2 %v139_v25, %s1856_s28 }
  0x64   :  { %v1565_v34 = vpop.permute.xlu2 %1564 }
  0x65   :  { %v1567_v62 = vunpack.i.h.bf16 %v1565_v34  ;;  %v1566_v63 = vunpack.i.l.bf16 %v1565_v34 }
  0x6c   :  { %v1570_v41 = vpop.permute.xlu2 %1569 }
  0x6d   :  { %v1572_v4 = vunpack.i.h.bf16 %v1570_v41  ;;  %v1571_v5 = vunpack.i.l.bf16 %v1570_v41 }
  0x74   :  { %v1585_v57 = vpop.permute.xlu2 %1584 }
  0x75   :  { %v1586_v34 = vunpack.i.l.bf16 %v1585_v57 }
  0x76   :  { %v1555_v9 = vpop.permute.xlu1 %1554 }
  0x77   :  { %v1557_v42 = vunpack.i.h.bf16 %v1555_v9  ;;  %v1556_v43 = vunpack.i.l.bf16 %v1555_v9  ;;  %v1587_v9 = vunpack.i.h.bf16 %v1585_v57 }
  0x79   :  { %v1545_v35 = vpop.permute.xlu0 %1544 }
  0x7a   :  { %v1547_v38 = vunpack.i.h.bf16 %v1545_v35  ;;  %v1546_v39 = vunpack.i.l.bf16 %v1545_v35 }
  0x7c   :  { %v265_v47 = vsel %vm263_vm5, %v1953_v1, %v1547_v38  ;;  %v264_v48 = vsel %vm263_vm5, %v1948_v0, %v1546_v39  ;;  %v2126_v12 = vpop.permute.xlu2 %1599 }
  0x7e   :  { %v1560_v40 = vpop.permute.xlu1 %1559 }
  0x7f   :  { %v1562_v60 = vunpack.i.h.bf16 %v1560_v40  ;;  %v1561_v61 = vunpack.i.l.bf16 %v1560_v40 }
  0x81   :  { %v1550_v44 = vpop.permute.xlu0 %1549  ;;  %v267_v0 = vsel %vm263_vm5, %v1968_v7, %v1562_v60  ;;  %v266_v3 = vsel %vm263_vm5, %v1958_v2, %v1561_v61 }
  0x82   :  { %v1552_v45 = vunpack.i.h.bf16 %v1550_v44  ;;  %v1551_v46 = vunpack.i.l.bf16 %v1550_v44  ;;  %v280_v6 = vsel %vm277_vm6, %v266_v3, %v1566_v63  ;;  %v281_v10 = vsel %vm277_vm6, %v267_v0, %v1567_v62 }
  0x83   :  { %v294_v14 = vsel %vm291_vm7, %v280_v6, %v1571_v5  ;;  %v295_v15 = vsel %vm291_vm7, %v281_v10, %v1572_v4  ;;  %v1602_v3 = vunpack.i.h.bf16 %v2126_v12  ;;  %v1601_v4 = vunpack.i.l.bf16 %v2126_v12 }
  0x84   :  { %v278_v51 = vsel %vm277_vm6, %v264_v48, %v1551_v46  ;;  %v279_v52 = vsel %vm277_vm6, %v265_v47, %v1552_v45  ;;  %v306_v16 = vpack.c.bf16 %v295_v15, %v294_v14  ;;  %v1615_v18 = vpop.permute.xlu2 %1614 }
  0x85   :  { %v292_v53 = vsel %vm291_vm7, %v278_v51, %v1556_v43  ;;  %v293_v54 = vsel %vm291_vm7, %v279_v52, %v1557_v42  ;;  %v1617_v28 = vunpack.i.h.bf16 %v1615_v18  ;;  %v1616_v29 = vunpack.i.l.bf16 %v1615_v18 }
  0x86   :  { %v305_v55 = vpack.c.bf16 %v293_v54, %v292_v53  ;;  %v1580_v56 = vpop.permute.xlu1 %1579 }
  0x87   :  { %v1582_v19 = vunpack.i.h.bf16 %v1580_v56  ;;  %v1581_v20 = vunpack.i.l.bf16 %v1580_v56 }
  0x88   :  { %1418 = vmatmul.msk.bf16.vlgmr.msra.gmra.mxu0 %vm323_vm8, %v305_v55 }
  0x89   :  { %v1575_v1 = vpop.permute.xlu0 %1574 }
  0x8a   :  { %v1577_v7 = vunpack.i.h.bf16 %v1575_v1  ;;  %v1576_v17 = vunpack.i.l.bf16 %v1575_v1 }
  0x8c   :  { %v269_v30 = vsel %vm263_vm5, %v1991_v22, %v1577_v7  ;;  %v268_v31 = vsel %vm263_vm5, %v1973_v8, %v1576_v17  ;;  %v1630_v53 = vpop.permute.xlu2 %1629 }
  0x8d   :  { %v282_v39 = vsel %vm277_vm6, %v268_v31, %v1581_v20  ;;  %v283_v40 = vsel %vm277_vm6, %v269_v30, %v1582_v19  ;;  %v1632_v56 = vunpack.i.h.bf16 %v1630_v53  ;;  %v1631_v57 = vunpack.i.l.bf16 %v1630_v53  ;;  %v2179_v19 = vld [vmem:[%s2732_s3] ss:$0 sm:$0xff]  ;;  %s1859_s3 = smov 16  }
  0x8e   :  { %v2124_v11 = vpop.permute.xlu1 %1594  ;;  %v297_v42 = vsel %vm291_vm7, %v283_v40, %v1587_v9 }
  0x8f   :  { %v1597_v54 = vunpack.i.h.bf16 %v2124_v11  ;;  %v1596_v55 = vunpack.i.l.bf16 %v2124_v11 }
  0x91   :  { %v1590_v13 = vpop.permute.xlu0 %1589 }
  0x92   :  { %v1592_v43 = vunpack.i.h.bf16 %v1590_v13  ;;  %v1591_v44 = vunpack.i.l.bf16 %v1590_v13 }
  0x94   :  { %v271_v60 = vsel %vm263_vm5, %v2015_v36, %v1592_v43  ;;  %v270_v61 = vsel %vm263_vm5, %v1996_v23, %v1591_v44  ;;  %v249_v15 = vpop.permute.xlu2 %248 }
  0x95   :  { %v284_v23 = vsel %vm277_vm6, %v270_v61, %v1596_v55  ;;  %v285_v6 = vsel %vm277_vm6, %v271_v60, %v1597_v54 }
  0x96   :  { %v1610_v2 = vpop.permute.xlu1 %1609  ;;  %v298_v10 = vsel %vm291_vm7, %v284_v23, %v1601_v4 }
  0x97   :  { %v1612_v24 = vunpack.i.h.bf16 %v1610_v2  ;;  %v1611_v25 = vunpack.i.l.bf16 %v1610_v2 }
  0x98   :  { %1419 = vmatmul.msk.bf16.gmra.mxu0 %vm323_vm8, %v306_v16 }
  0x99   :  { %v1605_v21 = vpop.permute.xlu0 %1604 }
  0x9a   :  { %v1607_v26 = vunpack.i.h.bf16 %v1605_v21  ;;  %v1606_v27 = vunpack.i.l.bf16 %v1605_v21 }
  0x9c   :  { %v273_v32 = vsel %vm263_vm5, %v2038_v49, %v1607_v26  ;;  %v272_v33 = vsel %vm263_vm5, %v2020_v37, %v1606_v27  ;;  %v296_v49 = vsel %vm291_vm7, %v282_v39, %v1586_v34 }
  0x9d   :  { %v286_v35 = vsel %vm277_vm6, %v272_v33, %v1611_v25  ;;  %v287_v38 = vsel %vm277_vm6, %v273_v32, %v1612_v24  ;;  %v307_v37 = vpack.c.bf16 %v297_v42, %v296_v49 }
  0x9e   :  { %v300_v22 = vsel %vm291_vm7, %v286_v35, %v1616_v29  ;;  %v301_v8 = vsel %vm291_vm7, %v287_v38, %v1617_v28  ;;  %v1625_v46 = vpop.permute.xlu1 %1624 }
  0x9f   :  { %v309_v41 = vpack.c.bf16 %v301_v8, %v300_v22  ;;  %v1627_v51 = vunpack.i.h.bf16 %v1625_v46  ;;  %v1626_v52 = vunpack.i.l.bf16 %v1625_v46 }
  0xa1   :  { %v1620_v45 = vpop.permute.xlu0 %1619 }
  0xa2   :  { %v1622_v47 = vunpack.i.h.bf16 %v1620_v45  ;;  %v1621_v48 = vunpack.i.l.bf16 %v1620_v45 }
  0xa4   :  { %v275_v1 = vsel %vm263_vm5, %v2056_v58, %v1622_v47  ;;  %v274_v62 = vsel %vm263_vm5, %v2043_v50, %v1621_v48  ;;  %v299_v50 = vsel %vm291_vm7, %v285_v6, %v1602_v3 }
  0xa5   :  { %v288_v63 = vsel %vm277_vm6, %v274_v62, %v1626_v52  ;;  %v289_v0 = vsel %vm277_vm6, %v275_v1, %v1627_v51  ;;  %v308_v11 = vpack.c.bf16 %v299_v50, %v298_v10 }
  0xa6   :  { %v302_v5 = vsel %vm291_vm7, %v288_v63, %v1631_v57  ;;  %v303_v36 = vsel %vm291_vm7, %v289_v0, %v1632_v56  ;;  %v209_v14 = vpop.permute.xlu1 %208 }
  0xa7   :  { %v310_v58 = vpack.c.bf16 %v303_v36, %v302_v5 }
  0xa8   :  { %1420 = vmatmul.msk.bf16.gmra.mxu0 %vm323_vm8, %v307_v37 }
  0xa9   :  { %v169_v13 = vpop.permute.xlu0 %168 }
  0xaa   :  { %v276_v12 = vsel %vm263_vm5, %v2061_v59, %v169_v13 }
  0xab   :  { %v290_v16 = vsel %vm277_vm6, %v276_v12, %v209_v14 }
  0xac   :  { %v304_v7 = vsel %vm291_vm7, %v290_v16, %v249_v15 }
  0xad   :  { %v311_v17 = vpack.c.bf16 %v304_v7, %v304_v7 }
  0xb8   :  { %1421 = vmatmul.msk.bf16.gmra.mxu0 %vm323_vm8, %v308_v11 }
  0xc8   :  { %1422 = vmatmul.msk.bf16.gmra.mxu0 %vm323_vm8, %v309_v41 }
  0xd8   :  { %1423 = vmatmul.msk.bf16.gmra.mxu0 %vm323_vm8, %v310_v58 }
  0xe8   :  { %1424 = vmatmul.msk.bf16.gmra.mxu0 %vm323_vm8, %v311_v17 }
 0x105   :  { %v358_v2 = vpop.f32.mrf.mxu0 }
 0x106   :  { %v359_v20 = vadd.f32 %v2179_v19, %v358_v2 }
 0x108   :  { %v2184_v26 = vmax.f32 %v359_v20, 0.0 }
 0x10a   :  { %v418_v32 = vrot.slane %v2184_v26, 1  ;;  %v456_v33 = vrot.slane %v2184_v26, 7 }
 0x10d   :  { %v360_v18 = vpop.f32.mrf.mxu0 }
 0x10e   :  { %v361_v59 = vadd.f32 %v2179_v19, %v360_v18 }
 0x110   :  { %v393_v24 = vmax.f32 %v361_v59, 0.0 }
 0x112   :  { %v419_v28 = vrot.slane %v393_v24, 1  ;;  %v472_v29 = vrot.slane %v393_v24, 7 }
 0x114   :  { %v420_v38 = vsel %vm79_vm0, %v418_v32, %v419_v28  ;;  %v473_v39 = vsel %vm108_vm1, %v456_v33, %v472_v29 }
 0x115   :  { %v363_v21 = vpop.f32.mrf.mxu0  ;;  %v459_v49 = vmax.f32 %v2184_v26, %v420_v38  ;;  %v514_v42 = vmax.f32 %v473_v39, %v393_v24 }
 0x116   :  { %v364_v25 = vadd.f32 %v2179_v19, %v363_v21 }
 0x117   :  { %v2200_v47 = vmax.f32 %v459_v49, %v514_v42 }
 0x118   :  { %v394_v27 = vmax.f32 %v364_v25, 0.0 }
 0x119   :  { %v553_v57 = vrot.slane %v2200_v47, 2 }
 0x11a   :  { %v421_v30 = vrot.slane %v394_v27, 1  ;;  %v474_v31 = vrot.slane %v394_v27, 7 }
 0x11c   :  { %v422_v9 = vsel %vm79_vm0, %v419_v28, %v421_v30  ;;  %v475_v34 = vsel %vm108_vm1, %v472_v29, %v474_v31 }
 0x11d   :  { %v365_v35 = vpop.f32.mrf.mxu0  ;;  %v460_v22 = vmax.f32 %v393_v24, %v422_v9  ;;  %v515_v8 = vmax.f32 %v475_v34, %v394_v27 }
 0x11e   :  { %v366_v40 = vadd.f32 %v2179_v19, %v365_v35 }
 0x11f   :  { %v2196_v44 = vmax.f32 %v460_v22, %v515_v8 }
 0x120   :  { %v395_v41 = vmax.f32 %v366_v40, 0.0 }
 0x121   :  { %v554_v55 = vrot.slane %v2196_v44, 2  ;;  %v2220_v13 = vrot.slane %v2196_v44, 6 }
 0x122   :  { %v423_v37 = vrot.slane %v395_v41, 1  ;;  %v476_v43 = vrot.slane %v395_v41, 7 }
 0x123   :  { %v555_v62 = vsel %vm345_vm4, %v553_v57, %v554_v55 }
 0x124   :  { %v424_v45 = vsel %vm79_vm0, %v421_v30, %v423_v37  ;;  %v477_v46 = vsel %vm108_vm1, %v474_v31, %v476_v43 }
 0x125   :  { %v461_v48 = vmax.f32 %v394_v27, %v424_v45  ;;  %v516_v51 = vmax.f32 %v477_v46, %v395_v41  ;;  %v368_v52 = vpop.f32.mrf.mxu0 }
 0x126   :  { %v369_v53 = vadd.f32 %v2179_v19, %v368_v52 }
 0x127   :  { %v2203_v54 = vmax.f32 %v461_v48, %v516_v51 }
 0x128   :  { %v396_v56 = vmax.f32 %v369_v53, 0.0 }
 0x129   :  { %v556_v60 = vrot.slane %v2203_v54, 2  ;;  %v579_v10 = vrot.slane %v2203_v54, 6 }
 0x12a   :  { %v425_v61 = vrot.slane %v396_v56, 1  ;;  %v478_v1 = vrot.slane %v396_v56, 7 }
 0x12b   :  { %v557_v63 = vsel %vm345_vm4, %v554_v55, %v556_v60  ;;  %v580_v16 = vsel %vm141_vm3, %v2220_v13, %v579_v10 }
 0x12c   :  { %v426_v0 = vsel %vm79_vm0, %v423_v37, %v425_v61  ;;  %v479_v3 = vsel %vm108_vm1, %v476_v43, %v478_v1  ;;  %v1633_v4 = vpack.i.bf16 %v557_v63, %v555_v62 }
 0x12d   :  { %v462_v5 = vmax.f32 %v395_v41, %v426_v0  ;;  %v517_v36 = vmax.f32 %v479_v3, %v396_v56  ;;  %v370_v23 = vpop.f32.mrf.mxu0 }
 0x12e   :  { %v371_v6 = vadd.f32 %v2179_v19, %v370_v23  ;;  %1634 = vrot.lane.b32.xlu0 %v1633_v4, %s1859_s3 }
 0x12f   :  { %v2214_v58 = vmax.f32 %v462_v5, %v517_v36 }
 0x130   :  { %v397_v50 = vmax.f32 %v371_v6, 0.0 }
 0x131   :  { %v1643_v11 = vpack.i.bf16 %v2214_v58, %v2203_v54  ;;  %v581_v14 = vrot.slane %v2214_v58, 6  ;;  %v558_v27 = vrot.slane %v2214_v58, 2 }
 0x132   :  { %v427_v12 = vrot.slane %v397_v50, 1  ;;  %v480_v15 = vrot.slane %v397_v50, 7 }
 0x133   :  { %1644 = vrot.lane.b32.xlu2 %v1643_v11, %s1860_s18  ;;  %v582_v7 = vsel %vm141_vm3, %v579_v10, %v581_v14  ;;  %v559_v32 = vsel %vm345_vm4, %v556_v60, %v558_v27 }
 0x134   :  { %v428_v17 = vsel %vm79_vm0, %v425_v61, %v427_v12  ;;  %v481_v2 = vsel %vm108_vm1, %v478_v1, %v480_v15  ;;  %v1638_v18 = vpack.i.bf16 %v582_v7, %v580_v16 }
 0x135   :  { %v463_v59 = vmax.f32 %v396_v56, %v428_v17  ;;  %v518_v20 = vmax.f32 %v481_v2, %v397_v50  ;;  %v373_v21 = vpop.f32.mrf.mxu0 }
 0x136   :  { %v374_v24 = vadd.f32 %v2179_v19, %v373_v21  ;;  %1639 = vrot.lane.b32.xlu1 %v1638_v18, %s1861_s19 }
 0x137   :  { %v2231_v25 = vmax.f32 %v463_v59, %v518_v20 }
 0x138   :  { %v398_v28 = vmax.f32 %v374_v24, 0.0 }
 0x139   :  { %v560_v29 = vrot.slane %v2231_v25, 2  ;;  %v583_v49 = vrot.slane %v2231_v25, 6 }
 0x13a   :  { %v429_v30 = vrot.slane %v398_v28, 1  ;;  %v482_v31 = vrot.slane %v398_v28, 7 }
 0x13b   :  { %v561_v9 = vsel %vm345_vm4, %v558_v27, %v560_v29  ;;  %v584_v48 = vsel %vm141_vm3, %v581_v14, %v583_v49 }
 0x13c   :  { %v430_v34 = vsel %vm79_vm0, %v427_v12, %v429_v30  ;;  %v483_v35 = vsel %vm108_vm1, %v480_v15, %v482_v31  ;;  %v1648_v38 = vpack.i.bf16 %v561_v9, %v559_v32 }
 0x13d   :  { %v464_v39 = vmax.f32 %v397_v50, %v430_v34  ;;  %v519_v40 = vmax.f32 %v483_v35, %v398_v28  ;;  %v375_v22 = vpop.f32.mrf.mxu0 }
 0x13e   :  { %v376_v8 = vadd.f32 %v2179_v19, %v375_v22  ;;  %1649 = vrot.lane.b32.xlu0 %v1648_v38, %s1859_s3 }
 0x13f   :  { %v2241_v41 = vmax.f32 %v464_v39, %v519_v40 }
 0x140   :  { %v399_v42 = vmax.f32 %v376_v8, 0.0 }
 0x141   :  { %v1658_v37 = vpack.i.bf16 %v2241_v41, %v2231_v25  ;;  %v585_v43 = vrot.slane %v2241_v41, 6  ;;  %v562_v62 = vrot.slane %v2241_v41, 2 }
 0x142   :  { %v431_v45 = vrot.slane %v399_v42, 1  ;;  %v484_v46 = vrot.slane %v399_v42, 7 }
 0x143   :  { %1659 = vrot.lane.b32.xlu2 %v1658_v37, %s1860_s18  ;;  %v586_v51 = vsel %vm141_vm3, %v583_v49, %v585_v43  ;;  %v563_v5 = vsel %vm345_vm4, %v560_v29, %v562_v62 }
 0x144   :  { %v432_v52 = vsel %vm79_vm0, %v429_v30, %v431_v45  ;;  %v485_v53 = vsel %vm108_vm1, %v482_v31, %v484_v46  ;;  %v1653_v55 = vpack.i.bf16 %v586_v51, %v584_v48 }
 0x145   :  { %v465_v56 = vmax.f32 %v398_v28, %v432_v52  ;;  %v520_v57 = vmax.f32 %v485_v53, %v399_v42  ;;  %v378_v60 = vpop.f32.mrf.mxu0 }
 0x146   :  { %v379_v61 = vadd.f32 %v2179_v19, %v378_v60  ;;  %1654 = vrot.lane.b32.xlu1 %v1653_v55, %s1861_s19 }
 0x147   :  { %v2254_v1 = vmax.f32 %v465_v56, %v520_v57 }
 0x148   :  { %v400_v63 = vmax.f32 %v379_v61, 0.0 }
 0x149   :  { %v564_v0 = vrot.slane %v2254_v1, 2  ;;  %v587_v16 = vrot.slane %v2254_v1, 6 }
 0x14a   :  { %v433_v3 = vrot.slane %v400_v63, 1  ;;  %v486_v4 = vrot.slane %v400_v63, 7 }
 0x14b   :  { %v565_v36 = vsel %vm345_vm4, %v562_v62, %v564_v0  ;;  %v588_v20 = vsel %vm141_vm3, %v585_v43, %v587_v16 }
 0x14c   :  { %v434_v23 = vsel %vm79_vm0, %v431_v45, %v433_v3  ;;  %v487_v6 = vsel %vm108_vm1, %v484_v46, %v486_v4  ;;  %v1663_v10 = vpack.i.bf16 %v565_v36, %v563_v5 }
 0x14d   :  { %v466_v50 = vmax.f32 %v399_v42, %v434_v23  ;;  %v521_v11 = vmax.f32 %v487_v6, %v400_v63  ;;  %v380_v14 = vpop.f32.mrf.mxu0 }
 0x14e   :  { %v381_v12 = vadd.f32 %v2179_v19, %v380_v14  ;;  %1664 = vrot.lane.b32.xlu0 %v1663_v10, %s1859_s3 }
 0x14f   :  { %v2264_v15 = vmax.f32 %v466_v50, %v521_v11 }
 0x150   :  { %v401_v7 = vmax.f32 %v381_v12, 0.0 }
 0x151   :  { %v1673_v17 = vpack.i.bf16 %v2264_v15, %v2254_v1  ;;  %v589_v2 = vrot.slane %v2264_v15, 6  ;;  %v566_v34 = vrot.slane %v2264_v15, 2 }
 0x152   :  { %v435_v18 = vrot.slane %v401_v7, 1  ;;  %v488_v59 = vrot.slane %v401_v7, 7 }
 0x153   :  { %1674 = vrot.lane.b32.xlu2 %v1673_v17, %s1860_s18  ;;  %v590_v21 = vsel %vm141_vm3, %v587_v16, %v589_v2  ;;  %v567_v22 = vsel %vm345_vm4, %v564_v0, %v566_v34  ;;  %v508_v16 = vrot.slane %v2184_v26, 5 }
 0x154   :  { %v436_v24 = vsel %vm79_vm0, %v433_v3, %v435_v18  ;;  %v489_v27 = vsel %vm108_vm1, %v486_v4, %v488_v59  ;;  %v1668_v28 = vpack.i.bf16 %v590_v21, %v588_v20 }
 0x155   :  { %v467_v29 = vmax.f32 %v400_v63, %v436_v24  ;;  %v522_v30 = vmax.f32 %v489_v27, %v401_v7  ;;  %v383_v31 = vpop.f32.mrf.mxu0 }
 0x156   :  { %v384_v32 = vadd.f32 %v2179_v19, %v383_v31  ;;  %1669 = vrot.lane.b32.xlu1 %v1668_v28, %s1861_s19 }
 0x157   :  { %v2277_v9 = vmax.f32 %v467_v29, %v522_v30 }
 0x158   :  { %v402_v35 = vmax.f32 %v384_v32, 0.0 }
 0x159   :  { %v568_v38 = vrot.slane %v2277_v9, 2  ;;  %v591_v52 = vrot.slane %v2277_v9, 6 }
 0x15a   :  { %v437_v39 = vrot.slane %v402_v35, 1  ;;  %v490_v40 = vrot.slane %v402_v35, 7 }
 0x15b   :  { %v569_v8 = vsel %vm345_vm4, %v566_v34, %v568_v38  ;;  %v592_v61 = vsel %vm141_vm3, %v589_v2, %v591_v52 }
 0x15c   :  { %v438_v49 = vsel %vm79_vm0, %v435_v18, %v437_v39  ;;  %v491_v42 = vsel %vm108_vm1, %v488_v59, %v490_v40  ;;  %v1678_v37 = vpack.i.bf16 %v569_v8, %v567_v22  ;;  %v1510_v22 = vld [vmem:[%s2734_s4 + $0x10] sm:$0xff]  ;;  %v1509_v8 = vld [vmem:[%s2734_s4 + $0x8] sm:$0xff] }
 0x15d   :  { %v468_v43 = vmax.f32 %v401_v7, %v438_v49  ;;  %v523_v45 = vmax.f32 %v491_v42, %v402_v35  ;;  %v385_v46 = vpop.f32.mrf.mxu0  ;;  %v511_v7 = vrot.slane %v2184_v26, 6  ;;  %v1508_v49 = vld [vmem:[%s2734_s4] sm:$0xff] }
 0x15e   :  { %v386_v48 = vadd.f32 %v2179_v19, %v385_v46  ;;  %1679 = vrot.lane.b32.xlu0 %v1678_v37, %s1859_s3 }
 0x15f   :  { %v2287_v51 = vmax.f32 %v468_v43, %v523_v45 }
 0x160   :  { %v403_v53 = vmax.f32 %v386_v48, 0.0 }
 0x161   :  { %v1688_v55 = vpack.i.bf16 %v2287_v51, %v2277_v9  ;;  %v593_v56 = vrot.slane %v2287_v51, 6  ;;  %v570_v10 = vrot.slane %v2287_v51, 2 }
 0x162   :  { %v439_v57 = vrot.slane %v403_v53, 1  ;;  %v492_v60 = vrot.slane %v403_v53, 7 }
 0x163   :  { %1689 = vrot.lane.b32.xlu2 %v1688_v55, %s1860_s18  ;;  %v594_v62 = vsel %vm141_vm3, %v591_v52, %v593_v56 }
 0x164   :  { %v440_v63 = vsel %vm79_vm0, %v437_v39, %v439_v57  ;;  %v493_v0 = vsel %vm108_vm1, %v490_v40, %v492_v60  ;;  %v1683_v3 = vpack.i.bf16 %v594_v62, %v592_v61  ;;  %v1511_v40 = vld [vmem:[%s2734_s4 + $0x18] sm:$0xff] }
 0x165   :  { %v469_v4 = vmax.f32 %v402_v35, %v440_v63  ;;  %v524_v5 = vmax.f32 %v493_v0, %v403_v53  ;;  %v388_v36 = vpop.f32.mrf.mxu0  ;;  %842 = vmatpush.bf16.msra.mxu1 %v1511_v40 }
 0x166   :  { %v389_v23 = vadd.f32 %v2179_v19, %v388_v36  ;;  %1684 = vrot.lane.b32.xlu1 %v1683_v3, %s1861_s19  ;;  %v571_v19 = vsel %vm345_vm4, %v568_v38, %v570_v10 }
 0x167   :  { %v2300_v6 = vmax.f32 %v469_v4, %v524_v5 }
 0x168   :  { %v2303_v50 = vmax.f32 %v389_v23, 0.0 }
 0x169   :  { %v572_v11 = vrot.slane %v2300_v6, 2  ;;  %v595_v31 = vrot.slane %v2300_v6, 6  ;;  %843 = vmatpush.bf16.msra.mxu1 %v1510_v22 }
 0x16a   :  { %v441_v14 = vrot.slane %v2303_v50, 1  ;;  %v494_v12 = vrot.slane %v2303_v50, 7  ;;  %v513_v27 = vsel %vm141_vm3, %v2303_v50, %v511_v7 }
 0x16b   :  { %v573_v17 = vsel %vm345_vm4, %v570_v10, %v572_v11  ;;  %v596_v35 = vsel %vm141_vm3, %v593_v56, %v595_v31 }
 0x16c   :  { %v442_v2 = vsel %vm79_vm0, %v439_v57, %v441_v14  ;;  %v2318_v18 = vsel %vm108_vm1, %v441_v14, %v456_v33  ;;  %v495_v59 = vsel %vm108_vm1, %v492_v60, %v494_v12  ;;  %v1693_v20 = vpack.i.bf16 %v573_v17, %v571_v19 }
 0x16d   :  { %v471_v21 = vmax.f32 %v2303_v50, %v2318_v18  ;;  %v510_v24 = vsel %vm137_vm2, %v495_v59, %v508_v16  ;;  %v390_v28 = vpop.f32.mrf.mxu0  ;;  %v470_v29 = vmax.f32 %v403_v53, %v442_v2  ;;  %844 = vmatpush.bf16.msra.mxu1 %v1509_v8  ;;  %vm1408_vm2 = vcmask 1024  }
 0x16e   :  { %v525_v30 = vmax.f32 %v510_v24, %v513_v27  ;;  %1694 = vrot.lane.b32.xlu0 %v1693_v20, %s1859_s3 }
 0x170   :  { %v2331_v33 = vmax.f32 %v470_v29, %v525_v30 }
 0x171   :  { %845 = vmatpush.bf16.msra.mxu1 %v1508_v49 }
 0x172   :  { %v1703_v32 = vpack.i.bf16 %v2331_v33, %v2300_v6  ;;  %v597_v34 = vrot.slane %v2331_v33, 6 }
 0x174   :  { %1704 = vrot.lane.b32.xlu2 %v1703_v32, %s1860_s18  ;;  %v598_v38 = vsel %vm141_vm3, %v595_v31, %v597_v34 }
 0x175   :  { %v1698_v39 = vpack.i.bf16 %v598_v38, %v596_v35 }
 0x177   :  { %1699 = vrot.lane.b32.xlu1 %v1698_v39, %s1861_s19 }
 0x18d   :  { %v1645_v45 = vpop.permute.xlu2 %1644 }
 0x18e   :  { %v1647_v53 = vunpack.i.h.bf16 %v1645_v45  ;;  %v1646_v55 = vunpack.i.l.bf16 %v1645_v45 }
 0x19d   :  { %v1660_v36 = vpop.permute.xlu2 %1659 }
 0x19e   :  { %v1662_v12 = vunpack.i.h.bf16 %v1660_v36  ;;  %v1661_v19 = vunpack.i.l.bf16 %v1660_v36 }
 0x1a0   :  { %v1635_v42 = vpop.permute.xlu0 %1634 }
 0x1a1   :  { %v1637_v37 = vunpack.i.h.bf16 %v1635_v42  ;;  %v1636_v43 = vunpack.i.l.bf16 %v1635_v42 }
 0x1a3   :  { %v733_v56 = vsel %vm731_vm9, %v2196_v44, %v1637_v37  ;;  %v732_v57 = vsel %vm731_vm9, %v2200_v47, %v1636_v43 }
 0x1a8   :  { %v1640_v46 = vpop.permute.xlu1 %1639 }
 0x1a9   :  { %v1642_v48 = vunpack.i.h.bf16 %v1640_v46  ;;  %v1641_v52 = vunpack.i.l.bf16 %v1640_v46 }
 0x1ab   :  { %v746_v60 = vsel %vm745_vm10, %v732_v57, %v1641_v52  ;;  %v747_v61 = vsel %vm745_vm10, %v733_v56, %v1642_v48 }
 0x1ac   :  { %v760_v62 = vsel %vm759_vm11, %v746_v60, %v1646_v55  ;;  %v761_v63 = vsel %vm759_vm11, %v747_v61, %v1647_v53 }
 0x1ad   :  { %v773_v0 = vpack.c.bf16 %v761_v63, %v760_v62  ;;  %v1675_v32 = vpop.permute.xlu2 %1674 }
 0x1ae   :  { %v1677_v39 = vunpack.i.h.bf16 %v1675_v32 }
 0x1af   :  { %1441 = vmatmul.msk.bf16.vlgmr.msra.gmra.mxu1 %vm816_vm12, %v773_v0 }
 0x1b0   :  { %v1650_v3 = vpop.permute.xlu0 %1649 }
 0x1b1   :  { %v1652_v4 = vunpack.i.h.bf16 %v1650_v3  ;;  %v1651_v5 = vunpack.i.l.bf16 %v1650_v3 }
 0x1b3   :  { %v735_v17 = vsel %vm731_vm9, %v2214_v58, %v1652_v4  ;;  %v734_v2 = vsel %vm731_vm9, %v2203_v54, %v1651_v5  ;;  %v1676_v54 = vunpack.i.l.bf16 %v1675_v32 }
 0x1b8   :  { %v1655_v23 = vpop.permute.xlu1 %1654 }
 0x1b9   :  { %v1657_v10 = vunpack.i.h.bf16 %v1655_v23  ;;  %v1656_v14 = vunpack.i.l.bf16 %v1655_v23 }
 0x1bb   :  { %v748_v59 = vsel %vm745_vm10, %v734_v2, %v1656_v14  ;;  %v749_v20 = vsel %vm745_vm10, %v735_v17, %v1657_v10 }
 0x1bc   :  { %v762_v24 = vsel %vm759_vm11, %v748_v59, %v1661_v19  ;;  %v763_v27 = vsel %vm759_vm11, %v749_v20, %v1662_v12 }
 0x1bd   :  { %v774_v28 = vpack.c.bf16 %v763_v27, %v762_v24  ;;  %v1690_v52 = vpop.permute.xlu2 %1689 }
 0x1be   :  { %v1692_v56 = vunpack.i.h.bf16 %v1690_v52 }
 0x1bf   :  { %1442 = vmatmul.msk.bf16.gmra.mxu1 %vm816_vm12, %v774_v28 }
 0x1c0   :  { %v1665_v29 = vpop.permute.xlu0 %1664 }
 0x1c1   :  { %v1667_v30 = vunpack.i.h.bf16 %v1665_v29  ;;  %v1666_v31 = vunpack.i.l.bf16 %v1665_v29 }
 0x1c3   :  { %v737_v40 = vsel %vm731_vm9, %v2241_v41, %v1667_v30  ;;  %v736_v22 = vsel %vm731_vm9, %v2231_v25, %v1666_v31  ;;  %v1691_v25 = vunpack.i.l.bf16 %v1690_v52 }
 0x1c8   :  { %v1670_v35 = vpop.permute.xlu1 %1669 }
 0x1c9   :  { %v1672_v58 = vunpack.i.h.bf16 %v1670_v35  ;;  %v1671_v38 = vunpack.i.l.bf16 %v1670_v35 }
 0x1cb   :  { %v750_v8 = vsel %vm745_vm10, %v736_v22, %v1671_v38  ;;  %v751_v49 = vsel %vm745_vm10, %v737_v40, %v1672_v58 }
 0x1cc   :  { %v764_v42 = vsel %vm759_vm11, %v750_v8, %v1676_v54  ;;  %v765_v37 = vsel %vm759_vm11, %v751_v49, %v1677_v39 }
 0x1cd   :  { %v775_v43 = vpack.c.bf16 %v765_v37, %v764_v42 }
 0x1ce   :  { %v1705_v23 = vpop.permute.xlu2 %1704 }
 0x1cf   :  { %1443 = vmatmul.msk.bf16.gmra.mxu1 %vm816_vm12, %v775_v43  ;;  %v1707_v12 = vunpack.i.h.bf16 %v1705_v23 }
 0x1d0   :  { %v1680_v45 = vpop.permute.xlu0 %1679 }
 0x1d1   :  { %v1682_v46 = vunpack.i.h.bf16 %v1680_v45  ;;  %v1681_v48 = vunpack.i.l.bf16 %v1680_v45 }
 0x1d3   :  { %v739_v57 = vsel %vm731_vm9, %v2264_v15, %v1682_v46  ;;  %v738_v60 = vsel %vm731_vm9, %v2254_v1, %v1681_v48  ;;  %v1706_v1 = vunpack.i.l.bf16 %v1705_v23 }
 0x1d8   :  { %v1685_v53 = vpop.permute.xlu1 %1684 }
 0x1d9   :  { %v1687_v41 = vunpack.i.h.bf16 %v1685_v53  ;;  %v1686_v55 = vunpack.i.l.bf16 %v1685_v53 }
 0x1db   :  { %v752_v61 = vsel %vm745_vm10, %v738_v60, %v1686_v55  ;;  %v753_v62 = vsel %vm745_vm10, %v739_v57, %v1687_v41  ;;  %v526_v57 = vmax.f32 %v508_v16, %v511_v7  ;;  %v574_v16 = vrot.slane %v2331_v33, 2 }
 0x1dc   :  { %v766_v63 = vsel %vm759_vm11, %v752_v61, %v1691_v25  ;;  %v767_v0 = vsel %vm759_vm11, %v753_v62, %v1692_v56 }
 0x1dd   :  { %v776_v3 = vpack.c.bf16 %v767_v0, %v766_v63  ;;  %v2446_v62 = vmax.f32 %v471_v21, %v526_v57 }
 0x1df   :  { %1444 = vmatmul.msk.bf16.gmra.mxu1 %vm816_vm12, %v776_v3  ;;  %v576_v7 = vrot.slane %v2446_v62, 2  ;;  %v599_v21 = vrot.slane %v2446_v62, 6 }
 0x1e0   :  { %v1695_v4 = vpop.permute.xlu0 %1694 }
 0x1e1   :  { %v1697_v5 = vunpack.i.h.bf16 %v1695_v4  ;;  %v1696_v36 = vunpack.i.l.bf16 %v1695_v4 }
 0x1e3   :  { %v741_v19 = vsel %vm731_vm9, %v2287_v51, %v1697_v5  ;;  %v740_v17 = vsel %vm731_vm9, %v2277_v9, %v1696_v36  ;;  %v2403_v51 = vld [vmem:[%s2733_s5] ss:$0 sm:$0xff]  ;;  %s1862_s5 = smov 96  }
 0x1e9   :  { %v1700_v10 = vpop.permute.xlu1 %1699 }
 0x1ea   :  { %v1702_v15 = vunpack.i.h.bf16 %v1700_v10  ;;  %v1701_v14 = vunpack.i.l.bf16 %v1700_v10  ;;  %v575_v10 = vsel %vm345_vm4, %v572_v11, %v574_v16 }
 0x1ec   :  { %v754_v2 = vsel %vm745_vm10, %v740_v17, %v1701_v14  ;;  %v755_v59 = vsel %vm745_vm10, %v741_v19, %v1702_v15  ;;  %v577_v15 = vsel %vm345_vm4, %v574_v16, %v576_v7 }
 0x1ed   :  { %v768_v20 = vsel %vm759_vm11, %v754_v2, %v1706_v1  ;;  %v769_v24 = vsel %vm759_vm11, %v755_v59, %v1707_v12  ;;  %v600_v1 = vsel %vm141_vm3, %v597_v34, %v599_v21  ;;  %v1738_v2 = vpack.i.bf16 %v577_v15, %v575_v10  ;;  %v1517_v10 = vld [vmem:[%s2736_s6 + $0x28] sm:$0xff]  ;;  %v1516_v15 = vld [vmem:[%s2736_s6 + $0x20] sm:$0xff] }
 0x1ee   :  { %v777_v27 = vpack.c.bf16 %v769_v24, %v768_v20  ;;  %v603_v59 = vrot.slane %v2200_v47, 4  ;;  %v604_v20 = vrot.slane %v2196_v44, 4 }
 0x1f0   :  { %1445 = vmatmul.msk.bf16.gmra.mxu1 %vm816_vm12, %v777_v27  ;;  %v607_v24 = vsel %vm602_vm13, %v600_v1, %v603_v59  ;;  %v605_v34 = vsel %vm602_vm13, %v603_v59, %v604_v20  ;;  %v1513_v1 = vld [vmem:[%s2736_s6 + $0x8] sm:$0xff] }
 0x22c   :  { %v847_v28 = vpop.f32.mrf.mxu1 }
 0x22d   :  { %v848_v30 = vadd.f32 %v2403_v51, %v847_v28 }
 0x22f   :  { %v2409_v35 = vmax.f32 %v848_v30, 0.0 }
 0x231   :  { %v907_v40 = vrot.slane %v2409_v35, 2 }
 0x234   :  { %v849_v29 = vpop.f32.mrf.mxu1 }
 0x235   :  { %v850_v9 = vadd.f32 %v2403_v51, %v849_v29 }
 0x237   :  { %v2407_v31 = vmax.f32 %v850_v9, 0.0  ;;  %v1743_v9 = vpack.i.bf16 %v605_v34, %v607_v24 }
 0x239   :  { %v908_v38 = vrot.slane %v2407_v31, 2  ;;  %v2425_v46 = vrot.slane %v2407_v31, 6 }
 0x23b   :  { %v909_v22 = vsel %vm345_vm4, %v907_v40, %v908_v38 }
 0x23c   :  { %v852_v32 = vpop.f32.mrf.mxu1 }
 0x23d   :  { %v853_v58 = vadd.f32 %v2403_v51, %v852_v32 }
 0x23f   :  { %v2413_v39 = vmax.f32 %v853_v58, 0.0 }
 0x241   :  { %v910_v54 = vrot.slane %v2413_v39, 2  ;;  %v933_v43 = vrot.slane %v2413_v39, 6 }
 0x243   :  { %v911_v8 = vsel %vm345_vm4, %v908_v38, %v910_v54  ;;  %v934_v53 = vsel %vm141_vm3, %v2425_v46, %v933_v43 }
 0x244   :  { %v854_v49 = vpop.f32.mrf.mxu1  ;;  %v1708_v42 = vpack.i.bf16 %v911_v8, %v909_v22  ;;  %v608_v22 = vrot.slane %v2200_v47, 6 }
 0x245   :  { %v855_v37 = vadd.f32 %v2403_v51, %v854_v49 }
 0x246   :  { %1709 = vrot.lane.b32.xlu0 %v1708_v42, %s1861_s19  ;;  %v611_v42 = vsel %vm141_vm3, %v2446_v62, %v608_v22 }
 0x247   :  { %v2422_v45 = vmax.f32 %v855_v37, 0.0  ;;  %v609_v37 = vsel %vm141_vm3, %v608_v22, %v2220_v13 }
 0x249   :  { %v935_v48 = vrot.slane %v2422_v45, 6  ;;  %v1718_v52 = vpack.i.bf16 %v2422_v45, %v2413_v39  ;;  %v912_v60 = vrot.slane %v2422_v45, 2 }
 0x24b   :  { %1719 = vrot.lane.b32.xlu2 %v1718_v52, %s1862_s5  ;;  %v936_v41 = vsel %vm141_vm3, %v933_v43, %v935_v48  ;;  %v913_v0 = vsel %vm345_vm4, %v910_v54, %v912_v60  ;;  %v1753_v52 = vpack.i.bf16 %v609_v37, %v611_v42 }
 0x24c   :  { %v857_v55 = vpop.f32.mrf.mxu1  ;;  %v1713_v56 = vpack.i.bf16 %v936_v41, %v934_v53 }
 0x24d   :  { %v858_v25 = vadd.f32 %v2403_v51, %v857_v55 }
 0x24e   :  { %1714 = vrot.lane.b32.xlu1 %v1713_v56, %s1863_s0 }
 0x24f   :  { %v2441_v61 = vmax.f32 %v858_v25, 0.0 }
 0x251   :  { %v914_v63 = vrot.slane %v2441_v61, 2  ;;  %v937_v50 = vrot.slane %v2441_v61, 6 }
 0x253   :  { %v915_v3 = vsel %vm345_vm4, %v912_v60, %v914_v63  ;;  %v938_v14 = vsel %vm141_vm3, %v935_v48, %v937_v50 }
 0x254   :  { %v859_v4 = vpop.f32.mrf.mxu1  ;;  %v1723_v5 = vpack.i.bf16 %v915_v3, %v913_v0 }
 0x255   :  { %v860_v26 = vadd.f32 %v2403_v51, %v859_v4 }
 0x256   :  { %1724 = vrot.lane.b32.xlu0 %v1723_v5, %s1861_s19 }
 0x257   :  { %v2456_v18 = vmax.f32 %v860_v26, 0.0 }
 0x259   :  { %v939_v36 = vrot.slane %v2456_v18, 6  ;;  %v1733_v23 = vpack.i.bf16 %v2456_v18, %v2441_v61  ;;  %v916_v27 = vrot.slane %v2456_v18, 2 }
 0x25b   :  { %1734 = vrot.lane.b32.xlu2 %v1733_v23, %s1862_s5  ;;  %v940_v12 = vsel %vm141_vm3, %v937_v50, %v939_v36  ;;  %v917_v44 = vsel %vm345_vm4, %v914_v63, %v916_v27  ;;  %v1519_v23 = vld [vmem:[%s2736_s6 + $0x38] sm:$0xff] }
 0x25c   :  { %v862_v19 = vpop.f32.mrf.mxu1  ;;  %v1728_v17 = vpack.i.bf16 %v940_v12, %v938_v14  ;;  %1199 = vmatpush.bf16.msra.mxu2 %v1519_v23  ;;  %1526 = vmatpush.bf16.msra.mxu3 %v1519_v23  ;;  %v1515_v14 = vld [vmem:[%s2736_s6 + $0x18] sm:$0xff]  ;;  %v1514_v12 = vld [vmem:[%s2736_s6 + $0x10] sm:$0xff] }
 0x25d   :  { %v863_v11 = vadd.f32 %v2403_v51, %v862_v19  ;;  %v1512_v19 = vld [vmem:[%s2736_s6] sm:$0xff] }
 0x25e   :  { %1729 = vrot.lane.b32.xlu1 %v1728_v17, %s1863_s0  ;;  %1739 = vrot.lane.b32.xlu0 %v1738_v2, %s1859_s3 }
 0x25f   :  { %v2479_v28 = vmax.f32 %v863_v11, 0.0 }
 0x261   :  { %v918_v29 = vrot.slane %v2479_v28, 2  ;;  %v941_v54 = vrot.slane %v2479_v28, 6 }
 0x263   :  { %1744 = vrot.lane.b32.xlu2 %v1743_v9, %s1861_s19  ;;  %v919_v30 = vsel %vm345_vm4, %v916_v27, %v918_v29  ;;  %v942_v43 = vsel %vm141_vm3, %v939_v36, %v941_v54  ;;  %v957_v36 = vrot.slane %v2407_v31, 4 }
 0x264   :  { %v864_v32 = vpop.f32.mrf.mxu1  ;;  %v1748_v58 = vpack.i.bf16 %v919_v30, %v917_v44 }
 0x265   :  { %v865_v38 = vadd.f32 %v2403_v51, %v864_v32 }
 0x266   :  { %1749 = vrot.lane.b32.xlu1 %v1748_v58, %s1861_s19 }
 0x267   :  { %v2489_v40 = vmax.f32 %v865_v38, 0.0 }
 0x269   :  { %v943_v8 = vrot.slane %v2489_v40, 6  ;;  %v1758_v49 = vpack.i.bf16 %v2489_v40, %v2479_v28  ;;  %v920_v56 = vrot.slane %v2489_v40, 2 }
 0x26b   :  { %1759 = vrot.lane.b32.xlu2 %v1758_v49, %s1862_s5  ;;  %v944_v48 = vsel %vm141_vm3, %v941_v54, %v943_v8  ;;  %v921_v60 = vsel %vm345_vm4, %v918_v29, %v920_v56 }
 0x26c   :  { %v1763_v53 = vpack.i.bf16 %v944_v48, %v942_v43 }
 0x26d   :  { %v867_v41 = vpop.f32.mrf.mxu1 }
 0x26e   :  { %v868_v55 = vadd.f32 %v2403_v51, %v867_v41  ;;  %1754 = vrot.lane.b32.xlu1 %v1753_v52, %s1860_s18  ;;  %1764 = vrot.lane.b32.xlu0 %v1763_v53, %s1863_s0 }
 0x270   :  { %v2506_v25 = vmax.f32 %v868_v55, 0.0 }
 0x272   :  { %v922_v57 = vrot.slane %v2506_v25, 2  ;;  %v945_v5 = vrot.slane %v2506_v25, 6 }
 0x273   :  { %676 = vrot.lane.b32.xlu2 %v604_v20, %s1861_s19 }
 0x274   :  { %v923_v63 = vsel %vm345_vm4, %v920_v56, %v922_v57  ;;  %v946_v50 = vsel %vm141_vm3, %v943_v8, %v945_v5 }
 0x275   :  { %v869_v0 = vpop.f32.mrf.mxu1  ;;  %v1768_v3 = vpack.i.bf16 %v923_v63, %v921_v60 }
 0x276   :  { %v870_v4 = vadd.f32 %v2403_v51, %v869_v0  ;;  %636 = vrot.lane.b32.xlu0 %v2200_v47, %s1859_s3 }
 0x277   :  { %1769 = vrot.lane.b32.xlu1 %v1768_v3, %s1861_s19 }
 0x278   :  { %v2519_v26 = vmax.f32 %v870_v4, 0.0 }
 0x27a   :  { %v947_v16 = vrot.slane %v2519_v26, 6  ;;  %v1778_v7 = vpack.i.bf16 %v2519_v26, %v2506_v25 }
 0x27c   :  { %1779 = vrot.lane.b32.xlu2 %v1778_v7, %s1862_s5  ;;  %v948_v21 = vsel %vm141_vm3, %v945_v5, %v947_v16 }
 0x27d   :  { %v1773_v47 = vpack.i.bf16 %v948_v21, %v946_v50 }
 0x27f   :  { %716 = vrot.lane.b32.xlu1 %v2220_v13, %s1860_s18  ;;  %1774 = vrot.lane.b32.xlu0 %v1773_v47, %s1863_s0  ;;  %v1518_v13 = vld [vmem:[%s2736_s6 + $0x30] sm:$0xff] }
 0x280   :  { %1200 = vmatpush.bf16.msra.mxu2 %v1518_v13  ;;  %1527 = vmatpush.bf16.msra.mxu3 %v1518_v13 }
 0x284   :  { %1069 = vrot.lane.b32.xlu2 %v2425_v46, %s1862_s5  ;;  %1201 = vmatpush.bf16.msra.mxu2 %v1517_v10 }
 0x285   :  { %1528 = vmatpush.bf16.msra.mxu3 %v1517_v10 }
 0x287   :  { %1029 = vrot.lane.b32.xlu1 %v957_v36, %s1863_s0  ;;  %989 = vrot.lane.b32.xlu0 %v2409_v35, %s1861_s19 }
 0x288   :  { %1202 = vmatpush.bf16.msra.mxu2 %v1516_v15 }
 0x289   :  { %1529 = vmatpush.bf16.msra.mxu3 %v1516_v15 }
 0x28c   :  { %1203 = vmatpush.bf16.msra.mxu2 %v1515_v14 }
 0x28d   :  { %1530 = vmatpush.bf16.msra.mxu3 %v1515_v14 }
 0x290   :  { %1204 = vmatpush.bf16.msra.mxu2 %v1514_v12 }
 0x291   :  { %1531 = vmatpush.bf16.msra.mxu3 %v1514_v12 }
 0x294   :  { %1205 = vmatpush.bf16.msra.mxu2 %v1513_v1 }
 0x295   :  { %1532 = vmatpush.bf16.msra.mxu3 %v1513_v1 }
 0x298   :  { %1206 = vmatpush.bf16.msra.mxu2 %v1512_v19 }
 0x299   :  { %1533 = vmatpush.bf16.msra.mxu3 %v1512_v19 }
 0x2a5   :  { %v1720_v20 = vpop.permute.xlu2 %1719 }
 0x2a6   :  { %v1722_v34 = vunpack.i.h.bf16 %v1720_v20  ;;  %v1721_v29 = vunpack.i.l.bf16 %v1720_v20 }
 0x2b5   :  { %v1735_v22 = vpop.permute.xlu2 %1734 }
 0x2b6   :  { %v1737_v53 = vunpack.i.h.bf16 %v1735_v22  ;;  %v1736_v41 = vunpack.i.l.bf16 %v1735_v22 }
 0x2b8   :  { %v1710_v17 = vpop.permute.xlu0 %1709 }
 0x2b9   :  { %v1712_v2 = vunpack.i.h.bf16 %v1710_v17  ;;  %v1711_v59 = vunpack.i.l.bf16 %v1710_v17 }
 0x2bb   :  { %v1085_v9 = vsel %vm745_vm10, %v2407_v31, %v1712_v2  ;;  %v1084_v44 = vsel %vm745_vm10, %v2409_v35, %v1711_v59 }
 0x2bd   :  { %v1745_v43 = vpop.permute.xlu2 %1744 }
 0x2be   :  { %v1747_v10 = vunpack.i.h.bf16 %v1745_v43  ;;  %v1746_v15 = vunpack.i.l.bf16 %v1745_v43 }
 0x2c0   :  { %v1715_v11 = vpop.permute.xlu1 %1714 }
 0x2c1   :  { %v1717_v24 = vunpack.i.h.bf16 %v1715_v11  ;;  %v1716_v27 = vunpack.i.l.bf16 %v1715_v11 }
 0x2c3   :  { %v1097_v30 = vsel %vm816_vm12, %v1084_v44, %v1716_v27  ;;  %v1098_v32 = vsel %vm816_vm12, %v1085_v9, %v1717_v24 }
 0x2c4   :  { %v1111_v58 = vsel %vm1110_vm14, %v1097_v30, %v1721_v29  ;;  %v1112_v38 = vsel %vm1110_vm14, %v1098_v32, %v1722_v34 }
 0x2c5   :  { %v1124_v54 = vpack.c.bf16 %v1112_v38, %v1111_v58  ;;  %v1760_v50 = vpop.permute.xlu2 %1759 }
 0x2c6   :  { %v1762_v14 = vunpack.i.h.bf16 %v1760_v50  ;;  %v1761_v12 = vunpack.i.l.bf16 %v1760_v50 }
 0x2c7   :  { %1207 = vmatmul.bf16.vlgmr.msra.gmra.mxu2 %v1124_v54 }
 0x2c8   :  { %v1725_v8 = vpop.permute.xlu0 %1724 }
 0x2c9   :  { %v1727_v49 = vunpack.i.h.bf16 %v1725_v8  ;;  %v1726_v42 = vunpack.i.l.bf16 %v1725_v8 }
 0x2cb   :  { %v1087_v55 = vsel %vm745_vm10, %v2422_v45, %v1727_v49  ;;  %v1086_v56 = vsel %vm745_vm10, %v2413_v39, %v1726_v42 }
 0x2cd   :  { %v677_v32 = vpop.permute.xlu2 %676 }
 0x2d0   :  { %v1730_v37 = vpop.permute.xlu1 %1729  ;;  %v1740_v5 = vpop.permute.xlu0 %1739 }
 0x2d1   :  { %v1732_v48 = vunpack.i.h.bf16 %v1730_v37  ;;  %v1731_v52 = vunpack.i.l.bf16 %v1730_v37  ;;  %v1742_v21 = vunpack.i.h.bf16 %v1740_v5  ;;  %v1741_v47 = vunpack.i.l.bf16 %v1740_v5 }
 0x2d3   :  { %v1099_v60 = vsel %vm816_vm12, %v1086_v56, %v1731_v52  ;;  %v1100_v63 = vsel %vm816_vm12, %v1087_v55, %v1732_v48  ;;  %v743_v39 = vsel %vm731_vm9, %v2331_v33, %v1742_v21  ;;  %v742_v13 = vsel %vm731_vm9, %v2300_v6, %v1741_v47 }
 0x2d4   :  { %v1113_v0 = vsel %vm1110_vm14, %v1099_v60, %v1736_v41  ;;  %v1114_v3 = vsel %vm1110_vm14, %v1100_v63, %v1737_v53  ;;  %v756_v33 = vsel %vm745_vm10, %v742_v13, %v1746_v15  ;;  %v757_v6 = vsel %vm745_vm10, %v743_v39, %v1747_v10  ;;  %v1523_v15 = vld [vmem:[%s2738_s8 + $0x18] sm:$0xff] }
 0x2d5   :  { %v1125_v4 = vpack.c.bf16 %v1114_v3, %v1113_v0  ;;  %1326 = vmatpush.bf16.msrb.mxu3 %v1523_v15 }
 0x2d6   :  { %v1780_v22 = vpop.permute.xlu2 %1779 }
 0x2d7   :  { %1212 = vmatmul.bf16.gmra.mxu2 %v1125_v4  ;;  %v1782_v48 = vunpack.i.h.bf16 %v1780_v22  ;;  %v1781_v55 = vunpack.i.l.bf16 %v1780_v22 }
 0x2d8   :  { %v1750_v7 = vpop.permute.xlu1 %1749 }
 0x2d9   :  { %v1752_v23 = vunpack.i.h.bf16 %v1750_v7  ;;  %v1751_v45 = vunpack.i.l.bf16 %v1750_v7 }
 0x2db   :  { %v1089_v11 = vsel %vm745_vm10, %v2456_v18, %v1752_v23  ;;  %v1088_v24 = vsel %vm745_vm10, %v2441_v61, %v1751_v45  ;;  %v1864_v23 = vmov 0   ;;  %v1269_v45 = vld [vmem:[%s2737_s1] sm:$0x3] }
 0x2dc   :  { %1783 = vset.pattern.permute.xlu0 %v1864_v23 }
 0x2dd   :  { %1273 = vperm.xlu0 %1783, %v1269_v45  }
 0x2e0   :  { %v1755_v1 = vpop.permute.xlu1 %1754  ;;  %v1765_v19 = vpop.permute.xlu0 %1764 }
 0x2e1   :  { %v1757_v17 = vunpack.i.h.bf16 %v1755_v1  ;;  %v1756_v2 = vunpack.i.l.bf16 %v1755_v1  ;;  %v1767_v59 = vunpack.i.h.bf16 %v1765_v19  ;;  %v1766_v20 = vunpack.i.l.bf16 %v1765_v19 }
 0x2e3   :  { %v770_v27 = vsel %vm759_vm11, %v756_v33, %v1756_v2  ;;  %v771_v34 = vsel %vm759_vm11, %v757_v6, %v1757_v17  ;;  %v1101_v29 = vsel %vm816_vm12, %v1088_v24, %v1766_v20  ;;  %v1102_v9 = vsel %vm816_vm12, %v1089_v11, %v1767_v59  ;;  %v1522_v17 = vld [vmem:[%s2738_s8 + $0x10] sm:$0xff]  ;;  %v1521_v11 = vld [vmem:[%s2738_s8 + $0x8] sm:$0xff] }
 0x2e4   :  { %v778_v44 = vpack.c.bf16 %v771_v34, %v770_v27  ;;  %v1115_v30 = vsel %vm1110_vm14, %v1101_v29, %v1761_v12  ;;  %v1116_v18 = vsel %vm1110_vm14, %v1102_v9, %v1762_v14  ;;  %1327 = vmatpush.bf16.msrb.mxu3 %v1522_v17  ;;  %v924_v59 = vrot.slane %v2519_v26, 2 }
 0x2e5   :  { %v1126_v58 = vpack.c.bf16 %v1116_v18, %v1115_v30  ;;  %v1520_v30 = vld [vmem:[%s2738_s8] sm:$0xff] }
 0x2e6   :  { %1446 = vmatmul.msk.bf16.gmra.mxu1 %vm816_vm12, %v778_v44  ;;  %v925_v6 = vsel %vm345_vm4, %v922_v57, %v924_v59 }
 0x2e7   :  { %1217 = vmatmul.bf16.gmra.mxu2 %v1126_v58 }
 0x2e8   :  { %v637_v61 = vpop.permute.xlu0 %636  ;;  %1328 = vmatpush.bf16.msrb.mxu3 %v1521_v11 }
 0x2e9   :  { %v1770_v38 = vpop.permute.xlu1 %1769  ;;  %v744_v54 = vsel %vm731_vm9, %v2446_v62, %v637_v61 }
 0x2ea   :  { %v1772_v8 = vunpack.i.h.bf16 %v1770_v38  ;;  %v1771_v49 = vunpack.i.l.bf16 %v1770_v38  ;;  %v758_v37 = vsel %vm745_vm10, %v744_v54, %v677_v32 }
 0x2ec   :  { %v1091_v56 = vsel %vm745_vm10, %v2489_v40, %v1772_v8  ;;  %v1090_v60 = vsel %vm745_vm10, %v2479_v28, %v1771_v49  ;;  %v2613_v40 = vld [vmem:[%s2735_s7] ss:$0 sm:$0xff]  ;;  %1329 = vmatpush.bf16.msrb.mxu3 %v1520_v30 }
 0x2f1   :  { %v717_v42 = vpop.permute.xlu1 %716  ;;  %v1775_v43 = vpop.permute.xlu0 %1774 }
 0x2f2   :  { %v772_v52 = vsel %vm759_vm11, %v758_v37, %v717_v42  ;;  %v1777_v53 = vunpack.i.h.bf16 %v1775_v43  ;;  %v1776_v41 = vunpack.i.l.bf16 %v1775_v43 }
 0x2f3   :  { %v779_v62 = vpack.c.bf16 %v772_v52, %v772_v52 }
 0x2f4   :  { %v1103_v63 = vsel %vm816_vm12, %v1090_v60, %v1776_v41  ;;  %v1104_v0 = vsel %vm816_vm12, %v1091_v56, %v1777_v53  ;;  %v961_v53 = vrot.slane %v2409_v35, 6 }
 0x2f5   :  { %v1117_v3 = vsel %vm1110_vm14, %v1103_v63, %v1781_v55  ;;  %v1118_v4 = vsel %vm1110_vm14, %v1104_v0, %v1782_v48 }
 0x2f6   :  { %1447 = vmatmul.msk.bf16.gmra.mxu1 %vm816_vm12, %v779_v62  ;;  %v1127_v5 = vpack.c.bf16 %v1118_v4, %v1117_v3  ;;  %v1070_v62 = vpop.permute.xlu2 %1069  ;;  %v956_v3 = vrot.slane %v2409_v35, 4 }
 0x2f8   :  { %1222 = vmatmul.bf16.gmra.mxu2 %v1127_v5 }
 0x2f9   :  { %v990_v52 = vpop.permute.xlu0 %989  ;;  %v1030_v41 = vpop.permute.xlu1 %1029 }
 0x34a   :  { %v1208_v7 = vpop.f32.mrf.mxu2 }
 0x34b   :  { %v1209_v28 = vadd.f32 %v2613_v40, %v1208_v7 }
 0x34d   :  { %1822 = vtanh.f32 %v1209_v28 }
 0x352   :  { %v1210_v50 = vpop.f32.mrf.mxu2 }
 0x353   :  { %v1823_v21 = vpop.eup %1822  ;;  %v1211_v47 = vadd.f32 %v2613_v40, %v1210_v50 }
 0x354   :  { %1255 = vst.msk [vmem:[#allocation2] sm:$0xff] %vm816_vm12, %v1823_v21 }
 0x355   :  { %1824 = vtanh.f32 %v1211_v47 }
 0x35a   :  { %v1213_v39 = vpop.f32.mrf.mxu2 }
 0x35b   :  { %v1825_v13 = vpop.eup %1824  ;;  %v1214_v10 = vadd.f32 %v2613_v40, %v1213_v39 }
 0x35d   :  { %1826 = vtanh.f32 %v1214_v10 }
 0x362   :  { %v1215_v14 = vpop.f32.mrf.mxu2 }
 0x363   :  { %v1827_v12 = vpop.eup %1826  ;;  %v1216_v1 = vadd.f32 %v2613_v40, %v1215_v14  ;;  %v872_v19 = vpop.f32.mrf.mxu1 }
 0x364   :  { %v873_v2 = vadd.f32 %v2403_v51, %v872_v19 }
 0x365   :  { %1828 = vtanh.f32 %v1216_v1 }
 0x366   :  { %v2631_v20 = vmax.f32 %v873_v2, 0.0 }
 0x368   :  { %v926_v24 = vrot.slane %v2631_v20, 2  ;;  %v949_v32 = vrot.slane %v2631_v20, 6 }
 0x36a   :  { %v1218_v33 = vpop.f32.mrf.mxu2  ;;  %v927_v27 = vsel %vm345_vm4, %v924_v59, %v926_v24  ;;  %v950_v38 = vsel %vm141_vm3, %v947_v16, %v949_v32 }
 0x36b   :  { %v1829_v34 = vpop.eup %1828  ;;  %v1219_v29 = vadd.f32 %v2613_v40, %v1218_v33  ;;  %v874_v9 = vpop.f32.mrf.mxu1  ;;  %v1784_v44 = vpack.i.bf16 %v927_v27, %v925_v6 }
 0x36c   :  { %v875_v18 = vadd.f32 %v2403_v51, %v874_v9  ;;  %v1274_v33 = vpop.permute.xlu0 %1273 }
 0x36d   :  { %1830 = vtanh.f32 %v1219_v29  ;;  %1785 = vrot.lane.b32.xlu1 %v1784_v44, %s1861_s19 }
 0x36e   :  { %v2648_v57 = vmax.f32 %v875_v18, 0.0 }
 0x370   :  { %v951_v58 = vrot.slane %v2648_v57, 6  ;;  %v1794_v37 = vpack.i.bf16 %v2648_v57, %v2631_v20  ;;  %v928_v48 = vrot.slane %v2648_v57, 2 }
 0x372   :  { %v1220_v61 = vpop.f32.mrf.mxu2  ;;  %v952_v54 = vsel %vm141_vm3, %v949_v32, %v951_v58  ;;  %v929_v5 = vsel %vm345_vm4, %v926_v24, %v928_v48 }
 0x373   :  { %v1831_v22 = vpop.eup %1830  ;;  %v1221_v8 = vadd.f32 %v2613_v40, %v1220_v61  ;;  %v877_v49 = vpop.f32.mrf.mxu1  ;;  %v1789_v42 = vpack.i.bf16 %v952_v54, %v950_v38 }
 0x374   :  { %v878_v43 = vadd.f32 %v2403_v51, %v877_v49  ;;  %v962_v51 = vsel %vm141_vm3, %v961_v53, %v2425_v46  ;;  %v958_v46 = vsel %vm602_vm13, %v956_v3, %v957_v36 }
 0x375   :  { %1832 = vtanh.f32 %v1221_v8  ;;  %1790 = vrot.lane.b32.xlu2 %v1789_v42, %s1863_s0  ;;  %1795 = vrot.lane.b32.xlu1 %v1794_v37, %s1862_s5 }
 0x376   :  { %v893_v16 = vmax.f32 %v878_v43, 0.0 }
 0x378   :  { %v930_v55 = vrot.slane %v893_v16, 2  ;;  %v953_v56 = vrot.slane %v893_v16, 6  ;;  %v1096_v60 = vsel %vm745_vm10, %v893_v16, %v990_v52  ;;  %v964_v0 = vsel %vm141_vm3, %v893_v16, %v961_v53 }
 0x379   :  { %v1109_v63 = vsel %vm816_vm12, %v1096_v60, %v1030_v41  ;;  %v1809_v13 = vpack.i.bf16 %v962_v51, %v964_v0  ;;  %v1817_v60 = vld [vmem:[%s2739_s9] ss:$0 sm:$0xff] }
 0x37a   :  { %v1123_v4 = vsel %vm1110_vm14, %v1109_v63, %v1070_v62  ;;  %v931_v7 = vsel %vm345_vm4, %v928_v48, %v930_v55  ;;  %v954_v28 = vsel %vm141_vm3, %v951_v58, %v953_v56  ;;  %v1524_v55 = vld [vmem:[%s2741_s11] sm:$0xff]  ;;  %v1279_v51 = vmul.f32 %v1817_v60, %v1274_v33 }
 0x37b   :  { %v1833_v50 = vpop.eup %1832  ;;  %v879_v21 = vpop.f32.mrf.mxu1  ;;  %v1130_v23 = vpack.c.bf16 %v1123_v4, %v1123_v4  ;;  %v1799_v45 = vpack.i.bf16 %v931_v7, %v929_v5  ;;  %v960_v39 = vsel %vm602_vm13, %v954_v28, %v956_v3  ;;  %v1818_v0 = vld [vmem:[%s2740_s10] ss:$0 sm:$0xff] }
 0x37c   :  { %v1223_v47 = vpop.f32.mrf.mxu2  ;;  %v1804_v10 = vpack.i.bf16 %v958_v46, %v960_v39  ;;  %v1284_v3 = vadd.f32 %v1818_v0, %v1279_v51 }
 0x37d   :  { %v1224_v35 = vadd.f32 %v2613_v40, %v1223_v47  ;;  %1237 = vmatmul.bf16.vlgmr.msra.gmra.mxu3 %v1130_v23  ;;  %1800 = vrot.lane.b32.xlu2 %v1799_v45, %s1861_s19 }
 0x37e   :  { %1810 = vrot.lane.b32.xlu1 %v1809_v13, %s1862_s5  ;;  %1805 = vrot.lane.b32.xlu0 %v1804_v10, %s1863_s0 }
 0x37f   :  { %1834 = vtanh.f32 %v1224_v35 }
 0x384   :  { %v1225_v15 = vpop.f32.mrf.mxu2 }
 0x385   :  { %v1835_v14 = vpop.eup %1834  ;;  %v1226_v31 = vadd.f32 %v2613_v40, %v1225_v15 }
 0x386   :  { %1261 = vst.msk [vmem:[#allocation2 + $0x30] sm:$0xff] %vm816_vm12, %v1835_v14 }
 0x387   :  { %1836 = vtanh.f32 %v1226_v31  ;;  %v20_v31 = vstv %s2744_s14 }
 0x388   :  { %21 = vst [vmem:[#allocation3] sm:$0x1] %v20_v31 }
 0x38d   :  { %v1837_v36 = vpop.eup %1836  ;;  %v1285_v12 = vld [vmem:[#allocation2] ss:$49 sm:$0x3] }
 0x38e   :  { %v1286_v1 = vpack.c.bf16 %v1285_v12, %v1285_v12  ;;  %v1819_v12 = vld [vmem:[%s2742_s12] ss:$0 sm:$0xff] }
 0x390   :  { %1496 = vmatmul.msk.bf16.vlgmr.msrb.gmra.mxu3 %vm816_vm12, %v1286_v1 }
 0x3cf   :  { %v1791_v59 = vpop.permute.xlu2 %1790 }
 0x3d0   :  { %v1793_v6 = vunpack.i.h.bf16 %v1791_v59  ;;  %v1792_v27 = vunpack.i.l.bf16 %v1791_v59 }
 0x3df   :  { %v1786_v19 = vpop.permute.xlu1 %1785 }
 0x3e0   :  { %v1788_v17 = vunpack.i.h.bf16 %v1786_v19  ;;  %v1787_v2 = vunpack.i.l.bf16 %v1786_v19 }
 0x3e2   :  { %v1093_v11 = vsel %vm745_vm10, %v2519_v26, %v1788_v17  ;;  %v1092_v24 = vsel %vm745_vm10, %v2506_v25, %v1787_v2  ;;  %v1525_v26 = vld [vmem:[%s2741_s11 + $0x8] sm:$0xff]  ;;  %v1801_v25 = vpop.permute.xlu2 %1800  ;;  %v1820_v17 = vld [vmem:[%s2743_s13] ss:$0 sm:$0xff] }
 0x3e3   :  { %v1105_v44 = vsel %vm816_vm12, %v1092_v24, %v1792_v27  ;;  %v1106_v30 = vsel %vm816_vm12, %v1093_v11, %v1793_v6  ;;  %1367 = vmatpush.bf16.msra.mxu3 %v1525_v26  ;;  %v1803_v61 = vunpack.i.h.bf16 %v1801_v25  ;;  %v1802_v38 = vunpack.i.l.bf16 %v1801_v25  ;;  %v1821_v24 = vld [vmem:[#allocation3] ss:$0 sm:$0xff] }
 0x3e5   :  { %v1095_v42 = vsel %vm745_vm10, %v2648_v57, %v1803_v61  ;;  %v1094_v37 = vsel %vm745_vm10, %v2631_v20, %v1802_v38 }
 0x3e7   :  { %v1796_v34 = vpop.permute.xlu1 %1795  ;;  %1368 = vmatpush.bf16.msra.mxu3 %v1524_v55 }
 0x3e8   :  { %v1798_v29 = vunpack.i.h.bf16 %v1796_v34  ;;  %v1797_v9 = vunpack.i.l.bf16 %v1796_v34 }
 0x3ea   :  { %v1119_v18 = vsel %vm1110_vm14, %v1105_v44, %v1797_v9  ;;  %v1120_v32 = vsel %vm1110_vm14, %v1106_v30, %v1798_v29 }
 0x3eb   :  { %v1128_v58 = vpack.c.bf16 %v1120_v32, %v1119_v18 }
 0x3ed   :  { %1227 = vmatmul.bf16.gmra.mxu2 %v1128_v58 }
 0x3f0   :  { %v1806_v54 = vpop.permute.xlu0 %1805  ;;  %v1811_v49 = vpop.permute.xlu1 %1810 }
 0x3f1   :  { %v1808_v22 = vunpack.i.h.bf16 %v1806_v54  ;;  %v1807_v8 = vunpack.i.l.bf16 %v1806_v54  ;;  %v1813_v16 = vunpack.i.h.bf16 %v1811_v49  ;;  %v1812_v52 = vunpack.i.l.bf16 %v1811_v49 }
 0x3f3   :  { %v1107_v43 = vsel %vm816_vm12, %v1094_v37, %v1807_v8  ;;  %v1108_v48 = vsel %vm816_vm12, %v1095_v42, %v1808_v22 }
 0x3f4   :  { %v1121_v53 = vsel %vm1110_vm14, %v1107_v43, %v1812_v52  ;;  %v1122_v41 = vsel %vm1110_vm14, %v1108_v48, %v1813_v16 }
 0x3f5   :  { %v1129_v56 = vpack.c.bf16 %v1122_v41, %v1121_v53 }
 0x3fd   :  { %1232 = vmatmul.bf16.gmra.mxu2 %v1129_v56 }
 0x400   :  { %v1238_v57 = vpop.f32.mrf.mxu3 }
 0x401   :  { %v1239_v20 = vadd.f32 %v2613_v40, %v1238_v57 }
 0x403   :  { %1838 = vtanh.f32 %v1239_v20 }
 0x408   :  { %v1240_v62 = vpop.f32.mrf.mxu3 }
 0x409   :  { %v1839_v63 = vpop.eup %1838 }
 0x413   :  { %v1331_v4 = vpop.f32.mrf.mxu3 }
 0x414   :  { %v1335_v5 = vadd.f32 %v1331_v4, %v1284_v3 }
 0x416   :  { %1840 = vtanh.f32 %v1335_v5 }
 0x41b   :  { %v1333_v7 = vpop.f32.mrf.mxu3 }
 0x41c   :  { %v1841_v28 = vpop.eup %1840 }
 0x41d   :  { %v1337_v50 = vpack.c.bf16 %v1841_v28, %v1841_v28 }
 0x41f   :  { %1505 = vmatmul.msk.bf16.vlgmr.msra.gmra.mxu3 %vm745_vm10, %v1337_v50 }
 0x470   :  { %v1228_v21 = vpop.f32.mrf.mxu2 }
 0x471   :  { %v1229_v47 = vadd.f32 %v2613_v40, %v1228_v21 }
 0x473   :  { %1842 = vtanh.f32 %v1229_v47 }
 0x478   :  { %v1230_v23 = vpop.f32.mrf.mxu2 }
 0x479   :  { %v1843_v45 = vpop.eup %1842  ;;  %v1231_v46 = vadd.f32 %v2613_v40, %v1230_v23 }
 0x47b   :  { %1844 = vtanh.f32 %v1231_v46 }
 0x480   :  { %v1233_v39 = vpop.f32.mrf.mxu2 }
 0x481   :  { %v1845_v35 = vpop.eup %1844  ;;  %v1234_v13 = vadd.f32 %v2613_v40, %v1233_v39 }
 0x483   :  { %1846 = vtanh.f32 %v1234_v13 }
 0x488   :  { %v1235_v10 = vpop.f32.mrf.mxu2 }
 0x489   :  { %v1847_v15 = vpop.eup %1846  ;;  %v1236_v14 = vadd.f32 %v2613_v40, %v1235_v10 }
 0x48b   :  { %1848 = vtanh.f32 %v1236_v14 }
 0x491   :  { %v1849_v36 = vpop.eup %1848 }
 0x4a2   :  { %v1370_v1 = vpop.f32.mrf.mxu3 }
 0x4a3   :  { %v1371_v19 = vadd.f32 %v1819_v12, %v1370_v1 }
 0x4a5   :  { %1850 = vtanh.f32 %v1371_v19 }
 0x4aa   :  { %v1372_v2 = vpop.f32.mrf.mxu3 }
 0x4ab   :  { %v1851_v40 = vpop.eup %1850 }
 0x4ac   :  { %v1379_v59 = vmul.f32 %v1851_v40, %v1820_v17 }
 0x4ae   :  { %v1381_v11 = vsel %vm1380_vm15, %v1379_v59, 0.0 }
 0x4af   :  { %1382 = vadd.xlane.f32.xlu2 %v1381_v11 }
 0x522   :  { %v1383_v33 = vpop.xlane.xlu2 %1382 }
 0x523   :  { %v1388_v6 = vadd.f32 %v1821_v24, %v1383_v33 }
 0x525   :  { %v1506_v27 = vmul.f32 -1.442695, %v1388_v6 }
 0x527   :  { %1852 = vpow2.f32 %v1506_v27 }
 0x52d   :  { %v1853_v34 = vpop.eup %1852 }
 0x52e   :  { %v1392_v29 = vadd.f32 1.0, %v1853_v34 }
 0x530   :  { %1854 = vrcp.f32 %v1392_v29  ;;  %v1404_v18 = vand.u32 2147483648, %v1392_v29  ;;  %v1402_v26 = vand.u32 2147483647, %v1392_v29  ;;  %vm1398_vm1 = vweird.f32 %v1392_v29 }
 0x532   :  { %v1405_v25 = vor.u32 1.1754944e-38, %v1404_v18  ;;  %vm1403_vm4 = vcmp.eq.f32.partialorder %v1402_v26, 8.507059e+37 }
 0x536   :  { %v1855_v9 = vpop.eup %1854 }
 0x537   :  { %v1394_v44 = vmul.f32 %v1855_v9, %v1392_v29  ;;  %vm1399_vm0 = vweird.f32 %v1855_v9 }
 0x538   :  { %vm1400_vm3 = vmor %vm1398_vm1, %vm1399_vm0 }
 0x539   :  { %v1395_v30 = vsub.f32 1.0, %v1394_v44 }
 0x53b   :  { %v1396_v32 = vmul.f32 %v1855_v9, %v1395_v30 }
 0x53d   :  { %v1397_v58 = vadd.f32 %v1855_v9, %v1396_v32 }
 0x53f   :  { %v1401_v61 = vsel %vm1400_vm3, %v1855_v9, %v1397_v58 }
 0x540   :  { %v1406_v38 = vsel %vm1403_vm4, %v1405_v25, %v1401_v61 }
 0x541   :  { %1409 = vst.msk [vmem:[%s2745_s15] sm:$0x3] %vm1408_vm2, %v1406_v38 }

</bundles_post_ra>
